<compile_context>
chip_gen: v6e
topology: v6e:2x2x1
jax: 0.10.0
libtpu: 0.0.40
codegen_flags: <defaults>
</compile_context>

<pallas_src>
import functools

import jax
import jax.numpy as jnp
import numpy as np
from jax.experimental import pallas as pl
from jax.experimental.pallas import tpu as pltpu


# ---------------------------------------------------------------------------
# Host-side (compile-time) constants
# ---------------------------------------------------------------------------
def _interp_coeffs(L: int, factor: int) -> np.ndarray:
    """Per-output-lane weights (a, b, c) such that (PyTorch linear upsample,
    align_corners=False):

        up[..., j] = a[j]*x[..., j//f - 1] + b[j]*x[..., j//f] + c[j]*x[..., j//f + 1]

    Out-of-range neighbours always carry a zero coefficient (edge clamping is
    folded in), so lane-rotated copies of the repeated input are exact even
    where the rotation wraps around."""
    L_out = L * factor
    j = np.arange(L_out)
    i = j // factor
    frac = (j % factor + 0.5) / factor - 0.5          # phase offset in (-0.5, 0.5)
    a = np.where(frac < 0, -frac, 0.0)
    b = np.where(frac < 0, 1.0 + frac, 1.0 - frac)
    c = np.where(frac < 0, 0.0, frac)
    left = (i == 0) & (frac < 0)                      # src clamped to 0 -> exactly x[0]
    a = np.where(left, 0.0, a)
    b = np.where(left, 1.0, b)
    right = (i == L - 1) & (frac >= 0)                # i1 clamped to L-1 -> exactly x[L-1]
    c = np.where(right, 0.0, c)
    b = np.where(right, 1.0, b)
    return np.stack([a, b, c]).astype(np.float32)     # (3, L_out)


def _vmem_budget():
    """Returns (per-step working-set budget, vmem_limit_bytes), derived from
    the running generation's VMEM capacity (v5e/v6e: 128 MiB, v7x: 64 MiB)."""
    cap = 64 * 1024 * 1024                            # conservative default (v7x-sized)
    try:
        cap = int(pltpu.get_tpu_info().vmem_capacity_bytes)
    except Exception:
        pass
    vmem_limit = max(32 * 2**20, min(int(cap * 0.75), 100 * 2**20))
    budget = min(int(cap * 0.45), 72 * 2**20)         # blocks + double buffers + temps
    return budget, vmem_limit


def _pick_batch_tile(B, C_in, C_out, L, L_out, budget):
    """Largest divisor of B whose per-step working set (double-buffered input
    and output blocks + live intermediates) fits the budget, preferring >= 8
    grid steps (pipeline steady state; both TCs on v7x) as long as blocks stay
    >= ~1 MiB."""
    def ws(d):          # bytes per grid step (f32), conservative
        return 4 * d * (2 * C_in * L + 2 * C_out * L_out
                        + (7 * C_in + 2 * C_out) * L_out)
    divs = [d for d in range(1, B + 1) if B % d == 0]
    fits = [d for d in divs if ws(d) <= budget] or [1]
    best = max(fits)
    MIN_BLOCK = 1 << 20
    for min_steps in (8, 4, 2):
        cand = [d for d in fits if B // d >= min_steps]
        if cand:
            d = max(cand)
            if ws(d) >= MIN_BLOCK or ws(best) < MIN_BLOCK:
                return d
    return best


# ---------------------------------------------------------------------------
# Kernel
# ---------------------------------------------------------------------------
def _upsample_conv_relu_kernel(x_ref, coef_ref, w_ref, b_ref, o_ref, *,
                               factor: int, pre_upsampled: bool, use_mxu: bool):
    # x_ref:    (TB, C_in, L)          (or (TB, C_in, L_out) if pre_upsampled)
    # coef_ref: (3, 1, L_out) f32      per-lane interpolation weights (a, b, c)
    # w_ref:    (3, C_in, C_out, 1)    f32 conv taps (VPU path)
    #           (3, C_out, C_in)       f32 conv taps (MXU path)
    # b_ref:    (C_out, 1) f32
    # o_ref:    (TB, C_out, L_out)
    tb, c_out, l_out = o_ref.shape
    c_in = x_ref.shape[1]

    x = x_ref[...].astype(jnp.float32)
    if pre_upsampled:
        xr = x                                         # nearest repeat done by XLA
    else:
        # nearest-neighbour lane repeat: xr[..., f*i + p] = x[..., i]
        l_in = x_ref.shape[2]
        xr = jnp.broadcast_to(x[..., None], (tb, c_in, l_in, factor))
        xr = xr.reshape(tb, c_in, l_out)

    coef = coef_ref[...]
    ca, cb, cc = coef[0], coef[1], coef[2]             # each (1, L_out)

    # Neighbours shifted by one *input* sample (= `factor` output lanes) via
    # XLU rotations; lanes whose rotation wraps around carry a zero coefficient.
    xr_prev = pltpu.roll(xr, factor, axis=2)           # xr_prev[j] = xr[j - f]
    xr_next = pltpu.roll(xr, l_out - factor, axis=2)   # xr_next[j] = xr[j + f]

    # Linear upsample (exact PyTorch semantics), f32 on the VPU.
    up = ca * xr_prev + cb * xr + cc * xr_next          # (TB, C_in, L_out)

    # 3-tap conv with padding=1: +-1 lane rotations; the conv's zero padding
    # becomes a single-lane mask at each end (iota select, no copies).
    lane = jax.lax.broadcasted_iota(jnp.int32, (1, 1, l_out), 2)
    up_prev = jnp.where(lane > 0, pltpu.roll(up, 1, axis=2), 0.0)          # up[j-1]
    up_next = jnp.where(lane < l_out - 1, pltpu.roll(up, l_out - 1, axis=2), 0.0)  # up[j+1]
    taps = (up_prev, up, up_next)

    w_all = w_ref[...]
    bias = b_ref[...]                                   # (C_out, 1)

    if use_mxu:
        # Large-channel path: one f32 dot per tap (no per-batch weight bcast).
        acc = None
        for t in range(3):
            y_t = jnp.einsum('oc,bcj->boj', w_all[t], taps[t],
                             preferred_element_type=jnp.float32)
            acc = y_t if acc is None else acc + y_t
    else:
        # Small-channel path: unrolled VPU outer products, f32 end to end.
        acc = None
        for t in range(3):
            for i in range(c_in):
                term = w_all[t, i] * taps[t][:, i:i + 1, :]   # (C_out,1)*(TB,1,L_out)
                acc = term if acc is None else acc + term

    y = acc + bias                                       # + bias, (TB, C_out, L_out)
    o_ref[...] = jnp.maximum(y, 0.0).astype(o_ref.dtype)  # activation = ReLU


# ---------------------------------------------------------------------------
# Wrapper
# ---------------------------------------------------------------------------
def upsampling_forward(x, w_conv, b_conv, factor: int, out_dtype=None):
    """x: (B, C_in, L) f32, w_conv: (C_out, C_in, 3), b_conv: (C_out,)
       -> (B, C_out, L*factor) (linear upsample -> conv1d(k=3, pad=1) -> ReLU).

    out_dtype defaults to x.dtype; pass jnp.bfloat16 to halve the (dominant)
    output HBM traffic when downstream tolerates it."""
    B, C_in, L = x.shape
    C_out = w_conv.shape[0]
    L_out = L * factor
    out_dtype = x.dtype if out_dtype is None else out_dtype

    use_mxu = (C_in * C_out) > 1024                      # VPU mix for small channels
    coef = jnp.asarray(_interp_coeffs(L, factor)).reshape(3, 1, L_out)
    if use_mxu:
        w_arg = jnp.transpose(w_conv, (2, 0, 1)).astype(jnp.float32)     # (3, C_out, C_in)
    else:
        w_arg = (jnp.transpose(w_conv, (2, 1, 0)).astype(jnp.float32)
                 .reshape(3, C_in, C_out, 1))                            # (3, C_in, C_out, 1)
    b_arg = b_conv.reshape(C_out, 1).astype(jnp.float32)

    budget, vmem_limit = _vmem_budget()
    TB = _pick_batch_tile(B, C_in, C_out, L, L_out, budget)

    def build(pre_upsampled: bool):
        Lx = L_out if pre_upsampled else L
        w_shape = w_arg.shape
        kern = functools.partial(_upsample_conv_relu_kernel, factor=factor,
                                 pre_upsampled=pre_upsampled, use_mxu=use_mxu)
        return pl.pallas_call(
            kern,
            out_shape=jax.ShapeDtypeStruct((B, C_out, L_out), out_dtype),
            grid=(B // TB,),
            in_specs=[
                pl.BlockSpec((TB, C_in, Lx), lambda b: (b, 0, 0)),
                pl.BlockSpec((3, 1, L_out), lambda b: (0, 0, 0)),
                pl.BlockSpec(w_shape, lambda b: (0,) * len(w_shape)),
                pl.BlockSpec((C_out, 1), lambda b: (0, 0)),
            ],
            out_specs=pl.BlockSpec((TB, C_out, L_out), lambda b: (b, 0, 0)),
            compiler_params=pltpu.CompilerParams(
                dimension_semantics=("parallel",),
                vmem_limit_bytes=int(vmem_limit),
            ),
        )

    fused = build(pre_upsampled=False)
    try:
        return jax.block_until_ready(jax.jit(fused)(x, coef, w_arg, b_arg))
    except Exception:
        # Narrow-in-effect fallback: ONLY the nearest-neighbour lane repeat is
        # moved out of the kernel (the one op whose Mosaic lowering varies by
        # toolchain).  Every other kernel op is identical, so genuine bugs
        # reproduce here and still raise (with the original error chained).
        # Cost: one extra HBM pass over the repeated input.
        xr = jnp.broadcast_to(x[..., None], (B, C_in, L, factor)).reshape(B, C_in, L_out)
        call = build(pre_upsampled=True)
        return jax.block_until_ready(jax.jit(call)(xr, coef, w_arg, b_arg))


# ---------------------------------------------------------------------------
# Pure-JAX reference mirroring the PyTorch forward
# ---------------------------------------------------------------------------
def reference_forward(x, w_conv, b_conv, factor: int):
    B, C_in, L = x.shape
    L_out = L * factor
    j = jnp.arange(L_out, dtype=jnp.float32)
    src = jnp.maximum((j + 0.5) / factor - 0.5, 0.0)
    i0 = jnp.floor(src).astype(jnp.int32)
    lam = src - i0.astype(jnp.float32)
    i1 = jnp.minimum(i0 + 1, L - 1)
    up = x[:, :, i0] * (1.0 - lam) + x[:, :, i1] * lam
    out = jax.lax.conv_general_dilated(
        up, w_conv, window_strides=(1,), padding=((1, 1),),
        dimension_numbers=("NCH", "OIH", "NCH"))
    out = out + b_conv[None, :, None]
    return jnp.maximum(out, 0.0)


if __name__ == "__main__":
    # Small deterministic example consistent with the module:
    # factor=2, in_c=4, out_c=8, activation=ReLU, input (B, C, L) = (2, 4, 16).
    B, C_in, C_out, L, factor = 2, 4, 8, 16, 2

    key = jax.random.PRNGKey(0)
    kx, kw, kb = jax.random.split(key, 3)
    x = jax.random.normal(kx, (B, C_in, L), dtype=jnp.float32)
    # Deterministic synthetic Conv1d parameters (shapes per nn.Conv1d(in_c, out_c, 3)).
    w_conv = 0.3 * jax.random.normal(kw, (C_out, C_in, 3), dtype=jnp.float32)
    b_conv = 0.1 * jax.random.normal(kb, (C_out,), dtype=jnp.float32)

    out = jax.block_until_ready(upsampling_forward(x, w_conv, b_conv, factor))
    ref = reference_forward(x, w_conv, b_conv, factor)

    assert out.shape == (B, C_out, L * factor), out.shape
    # Everything is f32 end to end now -> tight tolerance.
    assert jnp.allclose(out, ref, rtol=1e-4, atol=1e-5), \
        float(jnp.max(jnp.abs(out - ref)))
    print("KERNEL_OK")
</pallas_src>

<mosaic_0001>
module attributes {stable_mosaic.version = 11 : i64} {
  func.func @_upsample_conv_relu_kernel(%arg0: i32, %arg1: memref<1x4x16xf32, #tpu.memory_space<vmem>>, %arg2: memref<3x1x32xf32, #tpu.memory_space<vmem>>, %arg3: memref<3x4x8x1xf32, #tpu.memory_space<vmem>>, %arg4: memref<8x1xf32, #tpu.memory_space<vmem>>, %arg5: memref<1x8x32xf32, #tpu.memory_space<vmem>>) attributes {dimension_semantics = [#tpu.dimension_semantics<parallel>], iteration_bounds = array<i64: 2>, scalar_prefetch = 0 : i64, scratch_operands = 0 : i64, tpu.core_type = #tpu.core_type<tc>, window_params = [{transform_indices = @transform_0, window_bounds = array<i64: 1, 4, 16>}, {pipeline_mode = #tpu.pipeline_mode<synchronous>, transform_indices = @transform_1, window_bounds = array<i64: 3, 1, 32>}, {pipeline_mode = #tpu.pipeline_mode<synchronous>, transform_indices = @transform_2, window_bounds = array<i64: 3, 4, 8, 1>}, {pipeline_mode = #tpu.pipeline_mode<synchronous>, transform_indices = @transform_3, window_bounds = array<i64: 8, 1>}, {transform_indices = @transform_4, window_bounds = array<i64: 1, 8, 32>}]} {
    %c0 = arith.constant 0 : index
    %c0_0 = arith.constant 0 : index
    %c0_1 = arith.constant 0 : index
    %0 = vector.load %arg1[%c0, %c0_0, %c0_1] : memref<1x4x16xf32, #tpu.memory_space<vmem>>, vector<1x4x16xf32>
    %1 = vector.shape_cast %0 : vector<1x4x16xf32> to vector<1x4x16x1xf32>
    %2 = vector.shape_cast %1 : vector<1x4x16x1xf32> to vector<1x4x16x1xf32>
    %3 = vector.broadcast %2 : vector<1x4x16x1xf32> to vector<1x4x16x2xf32>
    %4 = vector.shape_cast %3 : vector<1x4x16x2xf32> to vector<1x4x32xf32>
    %c0_2 = arith.constant 0 : index
    %c0_3 = arith.constant 0 : index
    %c0_4 = arith.constant 0 : index
    %5 = vector.load %arg2[%c0_2, %c0_3, %c0_4] : memref<3x1x32xf32, #tpu.memory_space<vmem>>, vector<3x1x32xf32>
    %6 = vector.extract_strided_slice %5 {offsets = [0, 0, 0], sizes = [1, 1, 32], strides = [1, 1, 1]} : vector<3x1x32xf32> to vector<1x1x32xf32>
    %7 = vector.shape_cast %6 : vector<1x1x32xf32> to vector<1x32xf32>
    %8 = vector.extract_strided_slice %5 {offsets = [1, 0, 0], sizes = [1, 1, 32], strides = [1, 1, 1]} : vector<3x1x32xf32> to vector<1x1x32xf32>
    %9 = vector.shape_cast %8 : vector<1x1x32xf32> to vector<1x32xf32>
    %10 = vector.extract_strided_slice %5 {offsets = [2, 0, 0], sizes = [1, 1, 32], strides = [1, 1, 1]} : vector<3x1x32xf32> to vector<1x1x32xf32>
    %11 = vector.shape_cast %10 : vector<1x1x32xf32> to vector<1x32xf32>
    %c2_i32 = arith.constant 2 : i32
    %12 = tpu.dynamic_rotate %4 by %c2_i32 dim 2 : vector<1x4x32xf32>, i32 -> vector<1x4x32xf32>
    %c30_i32 = arith.constant 30 : i32
    %13 = tpu.dynamic_rotate %4 by %c30_i32 dim 2 : vector<1x4x32xf32>, i32 -> vector<1x4x32xf32>
    %14 = vector.shape_cast %7 : vector<1x32xf32> to vector<1x1x32xf32>
    %15 = vector.broadcast %14 : vector<1x1x32xf32> to vector<1x4x32xf32>
    %16 = arith.mulf %15, %12 : vector<1x4x32xf32>
    %17 = vector.shape_cast %9 : vector<1x32xf32> to vector<1x1x32xf32>
    %18 = vector.broadcast %17 : vector<1x1x32xf32> to vector<1x4x32xf32>
    %19 = arith.mulf %18, %4 : vector<1x4x32xf32>
    %20 = arith.addf %16, %19 : vector<1x4x32xf32>
    %21 = vector.shape_cast %11 : vector<1x32xf32> to vector<1x1x32xf32>
    %22 = vector.broadcast %21 : vector<1x1x32xf32> to vector<1x4x32xf32>
    %23 = arith.mulf %22, %13 : vector<1x4x32xf32>
    %24 = arith.addf %20, %23 : vector<1x4x32xf32>
    %25 = tpu.iota {dimensions = array<i32: 2>} : vector<1x1x32xi32>
    %c0_i32 = arith.constant 0 : i32
    %26 = vector.broadcast %c0_i32 : i32 to vector<1x1x32xi32>
    %27 = arith.cmpi sgt, %25, %26 : vector<1x1x32xi32>
    %c1_i32 = arith.constant 1 : i32
    %28 = tpu.dynamic_rotate %24 by %c1_i32 dim 2 : vector<1x4x32xf32>, i32 -> vector<1x4x32xf32>
    %cst = arith.constant 0.000000e+00 : f32
    %29 = vector.shape_cast %27 : vector<1x1x32xi1> to vector<1x1x32xi1>
    %30 = vector.broadcast %29 : vector<1x1x32xi1> to vector<1x4x32xi1>
    %31 = vector.broadcast %cst : f32 to vector<1x4x32xf32>
    %32 = arith.select %30, %28, %31 : vector<1x4x32xi1>, vector<1x4x32xf32>
    %c31_i32 = arith.constant 31 : i32
    %33 = vector.broadcast %c31_i32 : i32 to vector<1x1x32xi32>
    %34 = arith.cmpi slt, %25, %33 : vector<1x1x32xi32>
    %c31_i32_5 = arith.constant 31 : i32
    %35 = tpu.dynamic_rotate %24 by %c31_i32_5 dim 2 : vector<1x4x32xf32>, i32 -> vector<1x4x32xf32>
    %cst_6 = arith.constant 0.000000e+00 : f32
    %36 = vector.shape_cast %34 : vector<1x1x32xi1> to vector<1x1x32xi1>
    %37 = vector.broadcast %36 : vector<1x1x32xi1> to vector<1x4x32xi1>
    %38 = vector.broadcast %cst_6 : f32 to vector<1x4x32xf32>
    %39 = arith.select %37, %35, %38 : vector<1x4x32xi1>, vector<1x4x32xf32>
    %c0_7 = arith.constant 0 : index
    %c0_8 = arith.constant 0 : index
    %c0_9 = arith.constant 0 : index
    %c0_10 = arith.constant 0 : index
    %40 = vector.load %arg3[%c0_7, %c0_8, %c0_9, %c0_10] : memref<3x4x8x1xf32, #tpu.memory_space<vmem>>, vector<3x4x8x1xf32>
    %c0_11 = arith.constant 0 : index
    %c0_12 = arith.constant 0 : index
    %41 = vector.load %arg4[%c0_11, %c0_12] : memref<8x1xf32, #tpu.memory_space<vmem>>, vector<8x1xf32>
    %42 = vector.extract_strided_slice %40 {offsets = [0, 0, 0, 0], sizes = [1, 1, 8, 1], strides = [1, 1, 1, 1]} : vector<3x4x8x1xf32> to vector<1x1x8x1xf32>
    %43 = vector.shape_cast %42 : vector<1x1x8x1xf32> to vector<8x1xf32>
    %44 = vector.extract_strided_slice %32 {offsets = [0, 0, 0], sizes = [1, 1, 32], strides = [1, 1, 1]} : vector<1x4x32xf32> to vector<1x1x32xf32>
    %45 = vector.shape_cast %43 : vector<8x1xf32> to vector<1x8x1xf32>
    %46 = vector.broadcast %45 : vector<1x8x1xf32> to vector<1x8x32xf32>
    %47 = vector.broadcast %44 : vector<1x1x32xf32> to vector<1x8x32xf32>
    %48 = arith.mulf %46, %47 : vector<1x8x32xf32>
    %49 = vector.extract_strided_slice %40 {offsets = [0, 1, 0, 0], sizes = [1, 1, 8, 1], strides = [1, 1, 1, 1]} : vector<3x4x8x1xf32> to vector<1x1x8x1xf32>
    %50 = vector.shape_cast %49 : vector<1x1x8x1xf32> to vector<8x1xf32>
    %51 = vector.extract_strided_slice %32 {offsets = [0, 1, 0], sizes = [1, 1, 32], strides = [1, 1, 1]} : vector<1x4x32xf32> to vector<1x1x32xf32>
    %52 = vector.shape_cast %50 : vector<8x1xf32> to vector<1x8x1xf32>
    %53 = vector.broadcast %52 : vector<1x8x1xf32> to vector<1x8x32xf32>
    %54 = vector.broadcast %51 : vector<1x1x32xf32> to vector<1x8x32xf32>
    %55 = arith.mulf %53, %54 : vector<1x8x32xf32>
    %56 = arith.addf %48, %55 : vector<1x8x32xf32>
    %57 = vector.extract_strided_slice %40 {offsets = [0, 2, 0, 0], sizes = [1, 1, 8, 1], strides = [1, 1, 1, 1]} : vector<3x4x8x1xf32> to vector<1x1x8x1xf32>
    %58 = vector.shape_cast %57 : vector<1x1x8x1xf32> to vector<8x1xf32>
    %59 = vector.extract_strided_slice %32 {offsets = [0, 2, 0], sizes = [1, 1, 32], strides = [1, 1, 1]} : vector<1x4x32xf32> to vector<1x1x32xf32>
    %60 = vector.shape_cast %58 : vector<8x1xf32> to vector<1x8x1xf32>
    %61 = vector.broadcast %60 : vector<1x8x1xf32> to vector<1x8x32xf32>
    %62 = vector.broadcast %59 : vector<1x1x32xf32> to vector<1x8x32xf32>
    %63 = arith.mulf %61, %62 : vector<1x8x32xf32>
    %64 = arith.addf %56, %63 : vector<1x8x32xf32>
    %65 = vector.extract_strided_slice %40 {offsets = [0, 3, 0, 0], sizes = [1, 1, 8, 1], strides = [1, 1, 1, 1]} : vector<3x4x8x1xf32> to vector<1x1x8x1xf32>
    %66 = vector.shape_cast %65 : vector<1x1x8x1xf32> to vector<8x1xf32>
    %67 = vector.extract_strided_slice %32 {offsets = [0, 3, 0], sizes = [1, 1, 32], strides = [1, 1, 1]} : vector<1x4x32xf32> to vector<1x1x32xf32>
    %68 = vector.shape_cast %66 : vector<8x1xf32> to vector<1x8x1xf32>
    %69 = vector.broadcast %68 : vector<1x8x1xf32> to vector<1x8x32xf32>
    %70 = vector.broadcast %67 : vector<1x1x32xf32> to vector<1x8x32xf32>
    %71 = arith.mulf %69, %70 : vector<1x8x32xf32>
    %72 = arith.addf %64, %71 : vector<1x8x32xf32>
    %73 = vector.extract_strided_slice %40 {offsets = [1, 0, 0, 0], sizes = [1, 1, 8, 1], strides = [1, 1, 1, 1]} : vector<3x4x8x1xf32> to vector<1x1x8x1xf32>
    %74 = vector.shape_cast %73 : vector<1x1x8x1xf32> to vector<8x1xf32>
    %75 = vector.extract_strided_slice %24 {offsets = [0, 0, 0], sizes = [1, 1, 32], strides = [1, 1, 1]} : vector<1x4x32xf32> to vector<1x1x32xf32>
    %76 = vector.shape_cast %74 : vector<8x1xf32> to vector<1x8x1xf32>
    %77 = vector.broadcast %76 : vector<1x8x1xf32> to vector<1x8x32xf32>
    %78 = vector.broadcast %75 : vector<1x1x32xf32> to vector<1x8x32xf32>
    %79 = arith.mulf %77, %78 : vector<1x8x32xf32>
    %80 = arith.addf %72, %79 : vector<1x8x32xf32>
    %81 = vector.extract_strided_slice %40 {offsets = [1, 1, 0, 0], sizes = [1, 1, 8, 1], strides = [1, 1, 1, 1]} : vector<3x4x8x1xf32> to vector<1x1x8x1xf32>
    %82 = vector.shape_cast %81 : vector<1x1x8x1xf32> to vector<8x1xf32>
    %83 = vector.extract_strided_slice %24 {offsets = [0, 1, 0], sizes = [1, 1, 32], strides = [1, 1, 1]} : vector<1x4x32xf32> to vector<1x1x32xf32>
    %84 = vector.shape_cast %82 : vector<8x1xf32> to vector<1x8x1xf32>
    %85 = vector.broadcast %84 : vector<1x8x1xf32> to vector<1x8x32xf32>
    %86 = vector.broadcast %83 : vector<1x1x32xf32> to vector<1x8x32xf32>
    %87 = arith.mulf %85, %86 : vector<1x8x32xf32>
    %88 = arith.addf %80, %87 : vector<1x8x32xf32>
    %89 = vector.extract_strided_slice %40 {offsets = [1, 2, 0, 0], sizes = [1, 1, 8, 1], strides = [1, 1, 1, 1]} : vector<3x4x8x1xf32> to vector<1x1x8x1xf32>
    %90 = vector.shape_cast %89 : vector<1x1x8x1xf32> to vector<8x1xf32>
    %91 = vector.extract_strided_slice %24 {offsets = [0, 2, 0], sizes = [1, 1, 32], strides = [1, 1, 1]} : vector<1x4x32xf32> to vector<1x1x32xf32>
    %92 = vector.shape_cast %90 : vector<8x1xf32> to vector<1x8x1xf32>
    %93 = vector.broadcast %92 : vector<1x8x1xf32> to vector<1x8x32xf32>
    %94 = vector.broadcast %91 : vector<1x1x32xf32> to vector<1x8x32xf32>
    %95 = arith.mulf %93, %94 : vector<1x8x32xf32>
    %96 = arith.addf %88, %95 : vector<1x8x32xf32>
    %97 = vector.extract_strided_slice %40 {offsets = [1, 3, 0, 0], sizes = [1, 1, 8, 1], strides = [1, 1, 1, 1]} : vector<3x4x8x1xf32> to vector<1x1x8x1xf32>
    %98 = vector.shape_cast %97 : vector<1x1x8x1xf32> to vector<8x1xf32>
    %99 = vector.extract_strided_slice %24 {offsets = [0, 3, 0], sizes = [1, 1, 32], strides = [1, 1, 1]} : vector<1x4x32xf32> to vector<1x1x32xf32>
    %100 = vector.shape_cast %98 : vector<8x1xf32> to vector<1x8x1xf32>
    %101 = vector.broadcast %100 : vector<1x8x1xf32> to vector<1x8x32xf32>
    %102 = vector.broadcast %99 : vector<1x1x32xf32> to vector<1x8x32xf32>
    %103 = arith.mulf %101, %102 : vector<1x8x32xf32>
    %104 = arith.addf %96, %103 : vector<1x8x32xf32>
    %105 = vector.extract_strided_slice %40 {offsets = [2, 0, 0, 0], sizes = [1, 1, 8, 1], strides = [1, 1, 1, 1]} : vector<3x4x8x1xf32> to vector<1x1x8x1xf32>
    %106 = vector.shape_cast %105 : vector<1x1x8x1xf32> to vector<8x1xf32>
    %107 = vector.extract_strided_slice %39 {offsets = [0, 0, 0], sizes = [1, 1, 32], strides = [1, 1, 1]} : vector<1x4x32xf32> to vector<1x1x32xf32>
    %108 = vector.shape_cast %106 : vector<8x1xf32> to vector<1x8x1xf32>
    %109 = vector.broadcast %108 : vector<1x8x1xf32> to vector<1x8x32xf32>
    %110 = vector.broadcast %107 : vector<1x1x32xf32> to vector<1x8x32xf32>
    %111 = arith.mulf %109, %110 : vector<1x8x32xf32>
    %112 = arith.addf %104, %111 : vector<1x8x32xf32>
    %113 = vector.extract_strided_slice %40 {offsets = [2, 1, 0, 0], sizes = [1, 1, 8, 1], strides = [1, 1, 1, 1]} : vector<3x4x8x1xf32> to vector<1x1x8x1xf32>
    %114 = vector.shape_cast %113 : vector<1x1x8x1xf32> to vector<8x1xf32>
    %115 = vector.extract_strided_slice %39 {offsets = [0, 1, 0], sizes = [1, 1, 32], strides = [1, 1, 1]} : vector<1x4x32xf32> to vector<1x1x32xf32>
    %116 = vector.shape_cast %114 : vector<8x1xf32> to vector<1x8x1xf32>
    %117 = vector.broadcast %116 : vector<1x8x1xf32> to vector<1x8x32xf32>
    %118 = vector.broadcast %115 : vector<1x1x32xf32> to vector<1x8x32xf32>
    %119 = arith.mulf %117, %118 : vector<1x8x32xf32>
    %120 = arith.addf %112, %119 : vector<1x8x32xf32>
    %121 = vector.extract_strided_slice %40 {offsets = [2, 2, 0, 0], sizes = [1, 1, 8, 1], strides = [1, 1, 1, 1]} : vector<3x4x8x1xf32> to vector<1x1x8x1xf32>
    %122 = vector.shape_cast %121 : vector<1x1x8x1xf32> to vector<8x1xf32>
    %123 = vector.extract_strided_slice %39 {offsets = [0, 2, 0], sizes = [1, 1, 32], strides = [1, 1, 1]} : vector<1x4x32xf32> to vector<1x1x32xf32>
    %124 = vector.shape_cast %122 : vector<8x1xf32> to vector<1x8x1xf32>
    %125 = vector.broadcast %124 : vector<1x8x1xf32> to vector<1x8x32xf32>
    %126 = vector.broadcast %123 : vector<1x1x32xf32> to vector<1x8x32xf32>
    %127 = arith.mulf %125, %126 : vector<1x8x32xf32>
    %128 = arith.addf %120, %127 : vector<1x8x32xf32>
    %129 = vector.extract_strided_slice %40 {offsets = [2, 3, 0, 0], sizes = [1, 1, 8, 1], strides = [1, 1, 1, 1]} : vector<3x4x8x1xf32> to vector<1x1x8x1xf32>
    %130 = vector.shape_cast %129 : vector<1x1x8x1xf32> to vector<8x1xf32>
    %131 = vector.extract_strided_slice %39 {offsets = [0, 3, 0], sizes = [1, 1, 32], strides = [1, 1, 1]} : vector<1x4x32xf32> to vector<1x1x32xf32>
    %132 = vector.shape_cast %130 : vector<8x1xf32> to vector<1x8x1xf32>
    %133 = vector.broadcast %132 : vector<1x8x1xf32> to vector<1x8x32xf32>
    %134 = vector.broadcast %131 : vector<1x1x32xf32> to vector<1x8x32xf32>
    %135 = arith.mulf %133, %134 : vector<1x8x32xf32>
    %136 = arith.addf %128, %135 : vector<1x8x32xf32>
    %137 = vector.shape_cast %41 : vector<8x1xf32> to vector<1x8x1xf32>
    %138 = vector.broadcast %137 : vector<1x8x1xf32> to vector<1x8x32xf32>
    %139 = arith.addf %136, %138 : vector<1x8x32xf32>
    %cst_13 = arith.constant 0.000000e+00 : f32
    %140 = vector.broadcast %cst_13 : f32 to vector<1x8x32xf32>
    %141 = arith.maximumf %139, %140 : vector<1x8x32xf32>
    %c0_14 = arith.constant 0 : index
    %c0_15 = arith.constant 0 : index
    %c0_16 = arith.constant 0 : index
    %142 = vector.load %arg5[%c0_14, %c0_15, %c0_16] : memref<1x8x32xf32, #tpu.memory_space<vmem>>, vector<1x8x32xf32>
    tpu.vector_store %arg5[%c0_14, %c0_15, %c0_16], %141 {strides = array<i32>} : memref<1x8x32xf32, #tpu.memory_space<vmem>>, vector<1x8x32xf32>,
    return
  }
  func.func @transform_0(%arg0: i32) -> (i32, i32, i32) {
    %c0_i32 = arith.constant 0 : i32
    %c0_i32_0 = arith.constant 0 : i32
    %c0_i32_1 = arith.constant 0 : i32
    return %arg0, %c0_i32, %c0_i32_0 : i32, i32, i32
  }
  func.func @transform_1(%arg0: i32) -> (i32, i32, i32) {
    %c0_i32 = arith.constant 0 : i32
    %c0_i32_0 = arith.constant 0 : i32
    %c0_i32_1 = arith.constant 0 : i32
    %c0_i32_2 = arith.constant 0 : i32
    return %c0_i32, %c0_i32_0, %c0_i32_1 : i32, i32, i32
  }
  func.func @transform_2(%arg0: i32) -> (i32, i32, i32, i32) {
    %c0_i32 = arith.constant 0 : i32
    %c0_i32_0 = arith.constant 0 : i32
    %c0_i32_1 = arith.constant 0 : i32
    %c0_i32_2 = arith.constant 0 : i32
    %c0_i32_3 = arith.constant 0 : i32
    return %c0_i32, %c0_i32_0, %c0_i32_1, %c0_i32_2 : i32, i32, i32, i32
  }
  func.func @transform_3(%arg0: i32) -> (i32, i32) {
    %c0_i32 = arith.constant 0 : i32
    %c0_i32_0 = arith.constant 0 : i32
    %c0_i32_1 = arith.constant 0 : i32
    return %c0_i32, %c0_i32_0 : i32, i32
  }
  func.func @transform_4(%arg0: i32) -> (i32, i32, i32) {
    %c0_i32 = arith.constant 0 : i32
    %c0_i32_0 = arith.constant 0 : i32
    %c0_i32_1 = arith.constant 0 : i32
    return %arg0, %c0_i32, %c0_i32_0 : i32, i32, i32
  }
}

module attributes {stable_mosaic.version = 11 : i64} {
  func.func @_upsample_conv_relu_kernel(%arg0: i32, %arg1: memref<1x4x32xf32, #tpu.memory_space<vmem>>, %arg2: memref<3x1x32xf32, #tpu.memory_space<vmem>>, %arg3: memref<3x4x8x1xf32, #tpu.memory_space<vmem>>, %arg4: memref<8x1xf32, #tpu.memory_space<vmem>>, %arg5: memref<1x8x32xf32, #tpu.memory_space<vmem>>) attributes {dimension_semantics = [#tpu.dimension_semantics<parallel>], iteration_bounds = array<i64: 2>, scalar_prefetch = 0 : i64, scratch_operands = 0 : i64, tpu.core_type = #tpu.core_type<tc>, window_params = [{transform_indices = @transform_0, window_bounds = array<i64: 1, 4, 32>}, {pipeline_mode = #tpu.pipeline_mode<synchronous>, transform_indices = @transform_1, window_bounds = array<i64: 3, 1, 32>}, {pipeline_mode = #tpu.pipeline_mode<synchronous>, transform_indices = @transform_2, window_bounds = array<i64: 3, 4, 8, 1>}, {pipeline_mode = #tpu.pipeline_mode<synchronous>, transform_indices = @transform_3, window_bounds = array<i64: 8, 1>}, {transform_indices = @transform_4, window_bounds = array<i64: 1, 8, 32>}]} {
    %c0 = arith.constant 0 : index
    %c0_0 = arith.constant 0 : index
    %c0_1 = arith.constant 0 : index
    %0 = vector.load %arg1[%c0, %c0_0, %c0_1] : memref<1x4x32xf32, #tpu.memory_space<vmem>>, vector<1x4x32xf32>
    %c0_2 = arith.constant 0 : index
    %c0_3 = arith.constant 0 : index
    %c0_4 = arith.constant 0 : index
    %1 = vector.load %arg2[%c0_2, %c0_3, %c0_4] : memref<3x1x32xf32, #tpu.memory_space<vmem>>, vector<3x1x32xf32>
    %2 = vector.extract_strided_slice %1 {offsets = [0, 0, 0], sizes = [1, 1, 32], strides = [1, 1, 1]} : vector<3x1x32xf32> to vector<1x1x32xf32>
    %3 = vector.shape_cast %2 : vector<1x1x32xf32> to vector<1x32xf32>
    %4 = vector.extract_strided_slice %1 {offsets = [1, 0, 0], sizes = [1, 1, 32], strides = [1, 1, 1]} : vector<3x1x32xf32> to vector<1x1x32xf32>
    %5 = vector.shape_cast %4 : vector<1x1x32xf32> to vector<1x32xf32>
    %6 = vector.extract_strided_slice %1 {offsets = [2, 0, 0], sizes = [1, 1, 32], strides = [1, 1, 1]} : vector<3x1x32xf32> to vector<1x1x32xf32>
    %7 = vector.shape_cast %6 : vector<1x1x32xf32> to vector<1x32xf32>
    %c2_i32 = arith.constant 2 : i32
    %8 = tpu.dynamic_rotate %0 by %c2_i32 dim 2 : vector<1x4x32xf32>, i32 -> vector<1x4x32xf32>
    %c30_i32 = arith.constant 30 : i32
    %9 = tpu.dynamic_rotate %0 by %c30_i32 dim 2 : vector<1x4x32xf32>, i32 -> vector<1x4x32xf32>
    %10 = vector.shape_cast %3 : vector<1x32xf32> to vector<1x1x32xf32>
    %11 = vector.broadcast %10 : vector<1x1x32xf32> to vector<1x4x32xf32>
    %12 = arith.mulf %11, %8 : vector<1x4x32xf32>
    %13 = vector.shape_cast %5 : vector<1x32xf32> to vector<1x1x32xf32>
    %14 = vector.broadcast %13 : vector<1x1x32xf32> to vector<1x4x32xf32>
    %15 = arith.mulf %14, %0 : vector<1x4x32xf32>
    %16 = arith.addf %12, %15 : vector<1x4x32xf32>
    %17 = vector.shape_cast %7 : vector<1x32xf32> to vector<1x1x32xf32>
    %18 = vector.broadcast %17 : vector<1x1x32xf32> to vector<1x4x32xf32>
    %19 = arith.mulf %18, %9 : vector<1x4x32xf32>
    %20 = arith.addf %16, %19 : vector<1x4x32xf32>
    %21 = tpu.iota {dimensions = array<i32: 2>} : vector<1x1x32xi32>
    %c0_i32 = arith.constant 0 : i32
    %22 = vector.broadcast %c0_i32 : i32 to vector<1x1x32xi32>
    %23 = arith.cmpi sgt, %21, %22 : vector<1x1x32xi32>
    %c1_i32 = arith.constant 1 : i32
    %24 = tpu.dynamic_rotate %20 by %c1_i32 dim 2 : vector<1x4x32xf32>, i32 -> vector<1x4x32xf32>
    %cst = arith.constant 0.000000e+00 : f32
    %25 = vector.shape_cast %23 : vector<1x1x32xi1> to vector<1x1x32xi1>
    %26 = vector.broadcast %25 : vector<1x1x32xi1> to vector<1x4x32xi1>
    %27 = vector.broadcast %cst : f32 to vector<1x4x32xf32>
    %28 = arith.select %26, %24, %27 : vector<1x4x32xi1>, vector<1x4x32xf32>
    %c31_i32 = arith.constant 31 : i32
    %29 = vector.broadcast %c31_i32 : i32 to vector<1x1x32xi32>
    %30 = arith.cmpi slt, %21, %29 : vector<1x1x32xi32>
    %c31_i32_5 = arith.constant 31 : i32
    %31 = tpu.dynamic_rotate %20 by %c31_i32_5 dim 2 : vector<1x4x32xf32>, i32 -> vector<1x4x32xf32>
    %cst_6 = arith.constant 0.000000e+00 : f32
    %32 = vector.shape_cast %30 : vector<1x1x32xi1> to vector<1x1x32xi1>
    %33 = vector.broadcast %32 : vector<1x1x32xi1> to vector<1x4x32xi1>
    %34 = vector.broadcast %cst_6 : f32 to vector<1x4x32xf32>
    %35 = arith.select %33, %31, %34 : vector<1x4x32xi1>, vector<1x4x32xf32>
    %c0_7 = arith.constant 0 : index
    %c0_8 = arith.constant 0 : index
    %c0_9 = arith.constant 0 : index
    %c0_10 = arith.constant 0 : index
    %36 = vector.load %arg3[%c0_7, %c0_8, %c0_9, %c0_10] : memref<3x4x8x1xf32, #tpu.memory_space<vmem>>, vector<3x4x8x1xf32>
    %c0_11 = arith.constant 0 : index
    %c0_12 = arith.constant 0 : index
    %37 = vector.load %arg4[%c0_11, %c0_12] : memref<8x1xf32, #tpu.memory_space<vmem>>, vector<8x1xf32>
    %38 = vector.extract_strided_slice %36 {offsets = [0, 0, 0, 0], sizes = [1, 1, 8, 1], strides = [1, 1, 1, 1]} : vector<3x4x8x1xf32> to vector<1x1x8x1xf32>
    %39 = vector.shape_cast %38 : vector<1x1x8x1xf32> to vector<8x1xf32>
    %40 = vector.extract_strided_slice %28 {offsets = [0, 0, 0], sizes = [1, 1, 32], strides = [1, 1, 1]} : vector<1x4x32xf32> to vector<1x1x32xf32>
    %41 = vector.shape_cast %39 : vector<8x1xf32> to vector<1x8x1xf32>
    %42 = vector.broadcast %41 : vector<1x8x1xf32> to vector<1x8x32xf32>
    %43 = vector.broadcast %40 : vector<1x1x32xf32> to vector<1x8x32xf32>
    %44 = arith.mulf %42, %43 : vector<1x8x32xf32>
    %45 = vector.extract_strided_slice %36 {offsets = [0, 1, 0, 0], sizes = [1, 1, 8, 1], strides = [1, 1, 1, 1]} : vector<3x4x8x1xf32> to vector<1x1x8x1xf32>
    %46 = vector.shape_cast %45 : vector<1x1x8x1xf32> to vector<8x1xf32>
    %47 = vector.extract_strided_slice %28 {offsets = [0, 1, 0], sizes = [1, 1, 32], strides = [1, 1, 1]} : vector<1x4x32xf32> to vector<1x1x32xf32>
    %48 = vector.shape_cast %46 : vector<8x1xf32> to vector<1x8x1xf32>
    %49 = vector.broadcast %48 : vector<1x8x1xf32> to vector<1x8x32xf32>
    %50 = vector.broadcast %47 : vector<1x1x32xf32> to vector<1x8x32xf32>
    %51 = arith.mulf %49, %50 : vector<1x8x32xf32>
    %52 = arith.addf %44, %51 : vector<1x8x32xf32>
    %53 = vector.extract_strided_slice %36 {offsets = [0, 2, 0, 0], sizes = [1, 1, 8, 1], strides = [1, 1, 1, 1]} : vector<3x4x8x1xf32> to vector<1x1x8x1xf32>
    %54 = vector.shape_cast %53 : vector<1x1x8x1xf32> to vector<8x1xf32>
    %55 = vector.extract_strided_slice %28 {offsets = [0, 2, 0], sizes = [1, 1, 32], strides = [1, 1, 1]} : vector<1x4x32xf32> to vector<1x1x32xf32>
    %56 = vector.shape_cast %54 : vector<8x1xf32> to vector<1x8x1xf32>
    %57 = vector.broadcast %56 : vector<1x8x1xf32> to vector<1x8x32xf32>
    %58 = vector.broadcast %55 : vector<1x1x32xf32> to vector<1x8x32xf32>
    %59 = arith.mulf %57, %58 : vector<1x8x32xf32>
    %60 = arith.addf %52, %59 : vector<1x8x32xf32>
    %61 = vector.extract_strided_slice %36 {offsets = [0, 3, 0, 0], sizes = [1, 1, 8, 1], strides = [1, 1, 1, 1]} : vector<3x4x8x1xf32> to vector<1x1x8x1xf32>
    %62 = vector.shape_cast %61 : vector<1x1x8x1xf32> to vector<8x1xf32>
    %63 = vector.extract_strided_slice %28 {offsets = [0, 3, 0], sizes = [1, 1, 32], strides = [1, 1, 1]} : vector<1x4x32xf32> to vector<1x1x32xf32>
    %64 = vector.shape_cast %62 : vector<8x1xf32> to vector<1x8x1xf32>
    %65 = vector.broadcast %64 : vector<1x8x1xf32> to vector<1x8x32xf32>
    %66 = vector.broadcast %63 : vector<1x1x32xf32> to vector<1x8x32xf32>
    %67 = arith.mulf %65, %66 : vector<1x8x32xf32>
    %68 = arith.addf %60, %67 : vector<1x8x32xf32>
    %69 = vector.extract_strided_slice %36 {offsets = [1, 0, 0, 0], sizes = [1, 1, 8, 1], strides = [1, 1, 1, 1]} : vector<3x4x8x1xf32> to vector<1x1x8x1xf32>
    %70 = vector.shape_cast %69 : vector<1x1x8x1xf32> to vector<8x1xf32>
    %71 = vector.extract_strided_slice %20 {offsets = [0, 0, 0], sizes = [1, 1, 32], strides = [1, 1, 1]} : vector<1x4x32xf32> to vector<1x1x32xf32>
    %72 = vector.shape_cast %70 : vector<8x1xf32> to vector<1x8x1xf32>
    %73 = vector.broadcast %72 : vector<1x8x1xf32> to vector<1x8x32xf32>
    %74 = vector.broadcast %71 : vector<1x1x32xf32> to vector<1x8x32xf32>
    %75 = arith.mulf %73, %74 : vector<1x8x32xf32>
    %76 = arith.addf %68, %75 : vector<1x8x32xf32>
    %77 = vector.extract_strided_slice %36 {offsets = [1, 1, 0, 0], sizes = [1, 1, 8, 1], strides = [1, 1, 1, 1]} : vector<3x4x8x1xf32> to vector<1x1x8x1xf32>
    %78 = vector.shape_cast %77 : vector<1x1x8x1xf32> to vector<8x1xf32>
    %79 = vector.extract_strided_slice %20 {offsets = [0, 1, 0], sizes = [1, 1, 32], strides = [1, 1, 1]} : vector<1x4x32xf32> to vector<1x1x32xf32>
    %80 = vector.shape_cast %78 : vector<8x1xf32> to vector<1x8x1xf32>
    %81 = vector.broadcast %80 : vector<1x8x1xf32> to vector<1x8x32xf32>
    %82 = vector.broadcast %79 : vector<1x1x32xf32> to vector<1x8x32xf32>
    %83 = arith.mulf %81, %82 : vector<1x8x32xf32>
    %84 = arith.addf %76, %83 : vector<1x8x32xf32>
    %85 = vector.extract_strided_slice %36 {offsets = [1, 2, 0, 0], sizes = [1, 1, 8, 1], strides = [1, 1, 1, 1]} : vector<3x4x8x1xf32> to vector<1x1x8x1xf32>
    %86 = vector.shape_cast %85 : vector<1x1x8x1xf32> to vector<8x1xf32>
    %87 = vector.extract_strided_slice %20 {offsets = [0, 2, 0], sizes = [1, 1, 32], strides = [1, 1, 1]} : vector<1x4x32xf32> to vector<1x1x32xf32>
    %88 = vector.shape_cast %86 : vector<8x1xf32> to vector<1x8x1xf32>
    %89 = vector.broadcast %88 : vector<1x8x1xf32> to vector<1x8x32xf32>
    %90 = vector.broadcast %87 : vector<1x1x32xf32> to vector<1x8x32xf32>
    %91 = arith.mulf %89, %90 : vector<1x8x32xf32>
    %92 = arith.addf %84, %91 : vector<1x8x32xf32>
    %93 = vector.extract_strided_slice %36 {offsets = [1, 3, 0, 0], sizes = [1, 1, 8, 1], strides = [1, 1, 1, 1]} : vector<3x4x8x1xf32> to vector<1x1x8x1xf32>
    %94 = vector.shape_cast %93 : vector<1x1x8x1xf32> to vector<8x1xf32>
    %95 = vector.extract_strided_slice %20 {offsets = [0, 3, 0], sizes = [1, 1, 32], strides = [1, 1, 1]} : vector<1x4x32xf32> to vector<1x1x32xf32>
    %96 = vector.shape_cast %94 : vector<8x1xf32> to vector<1x8x1xf32>
    %97 = vector.broadcast %96 : vector<1x8x1xf32> to vector<1x8x32xf32>
    %98 = vector.broadcast %95 : vector<1x1x32xf32> to vector<1x8x32xf32>
    %99 = arith.mulf %97, %98 : vector<1x8x32xf32>
    %100 = arith.addf %92, %99 : vector<1x8x32xf32>
    %101 = vector.extract_strided_slice %36 {offsets = [2, 0, 0, 0], sizes = [1, 1, 8, 1], strides = [1, 1, 1, 1]} : vector<3x4x8x1xf32> to vector<1x1x8x1xf32>
    %102 = vector.shape_cast %101 : vector<1x1x8x1xf32> to vector<8x1xf32>
    %103 = vector.extract_strided_slice %35 {offsets = [0, 0, 0], sizes = [1, 1, 32], strides = [1, 1, 1]} : vector<1x4x32xf32> to vector<1x1x32xf32>
    %104 = vector.shape_cast %102 : vector<8x1xf32> to vector<1x8x1xf32>
    %105 = vector.broadcast %104 : vector<1x8x1xf32> to vector<1x8x32xf32>
    %106 = vector.broadcast %103 : vector<1x1x32xf32> to vector<1x8x32xf32>
    %107 = arith.mulf %105, %106 : vector<1x8x32xf32>
    %108 = arith.addf %100, %107 : vector<1x8x32xf32>
    %109 = vector.extract_strided_slice %36 {offsets = [2, 1, 0, 0], sizes = [1, 1, 8, 1], strides = [1, 1, 1, 1]} : vector<3x4x8x1xf32> to vector<1x1x8x1xf32>
    %110 = vector.shape_cast %109 : vector<1x1x8x1xf32> to vector<8x1xf32>
    %111 = vector.extract_strided_slice %35 {offsets = [0, 1, 0], sizes = [1, 1, 32], strides = [1, 1, 1]} : vector<1x4x32xf32> to vector<1x1x32xf32>
    %112 = vector.shape_cast %110 : vector<8x1xf32> to vector<1x8x1xf32>
    %113 = vector.broadcast %112 : vector<1x8x1xf32> to vector<1x8x32xf32>
    %114 = vector.broadcast %111 : vector<1x1x32xf32> to vector<1x8x32xf32>
    %115 = arith.mulf %113, %114 : vector<1x8x32xf32>
    %116 = arith.addf %108, %115 : vector<1x8x32xf32>
    %117 = vector.extract_strided_slice %36 {offsets = [2, 2, 0, 0], sizes = [1, 1, 8, 1], strides = [1, 1, 1, 1]} : vector<3x4x8x1xf32> to vector<1x1x8x1xf32>
    %118 = vector.shape_cast %117 : vector<1x1x8x1xf32> to vector<8x1xf32>
    %119 = vector.extract_strided_slice %35 {offsets = [0, 2, 0], sizes = [1, 1, 32], strides = [1, 1, 1]} : vector<1x4x32xf32> to vector<1x1x32xf32>
    %120 = vector.shape_cast %118 : vector<8x1xf32> to vector<1x8x1xf32>
    %121 = vector.broadcast %120 : vector<1x8x1xf32> to vector<1x8x32xf32>
    %122 = vector.broadcast %119 : vector<1x1x32xf32> to vector<1x8x32xf32>
    %123 = arith.mulf %121, %122 : vector<1x8x32xf32>
    %124 = arith.addf %116, %123 : vector<1x8x32xf32>
    %125 = vector.extract_strided_slice %36 {offsets = [2, 3, 0, 0], sizes = [1, 1, 8, 1], strides = [1, 1, 1, 1]} : vector<3x4x8x1xf32> to vector<1x1x8x1xf32>
    %126 = vector.shape_cast %125 : vector<1x1x8x1xf32> to vector<8x1xf32>
    %127 = vector.extract_strided_slice %35 {offsets = [0, 3, 0], sizes = [1, 1, 32], strides = [1, 1, 1]} : vector<1x4x32xf32> to vector<1x1x32xf32>
    %128 = vector.shape_cast %126 : vector<8x1xf32> to vector<1x8x1xf32>
    %129 = vector.broadcast %128 : vector<1x8x1xf32> to vector<1x8x32xf32>
    %130 = vector.broadcast %127 : vector<1x1x32xf32> to vector<1x8x32xf32>
    %131 = arith.mulf %129, %130 : vector<1x8x32xf32>
    %132 = arith.addf %124, %131 : vector<1x8x32xf32>
    %133 = vector.shape_cast %37 : vector<8x1xf32> to vector<1x8x1xf32>
    %134 = vector.broadcast %133 : vector<1x8x1xf32> to vector<1x8x32xf32>
    %135 = arith.addf %132, %134 : vector<1x8x32xf32>
    %cst_13 = arith.constant 0.000000e+00 : f32
    %136 = vector.broadcast %cst_13 : f32 to vector<1x8x32xf32>
    %137 = arith.maximumf %135, %136 : vector<1x8x32xf32>
    %c0_14 = arith.constant 0 : index
    %c0_15 = arith.constant 0 : index
    %c0_16 = arith.constant 0 : index
    %138 = vector.load %arg5[%c0_14, %c0_15, %c0_16] : memref<1x8x32xf32, #tpu.memory_space<vmem>>, vector<1x8x32xf32>
    tpu.vector_store %arg5[%c0_14, %c0_15, %c0_16], %137 {strides = array<i32>} : memref<1x8x32xf32, #tpu.memory_space<vmem>>, vector<1x8x32xf32>,
    return
  }
  func.func @transform_0(%arg0: i32) -> (i32, i32, i32) {
    %c0_i32 = arith.constant 0 : i32
    %c0_i32_0 = arith.constant 0 : i32
    %c0_i32_1 = arith.constant 0 : i32
    return %arg0, %c0_i32, %c0_i32_0 : i32, i32, i32
  }
  func.func @transform_1(%arg0: i32) -> (i32, i32, i32) {
    %c0_i32 = arith.constant 0 : i32
    %c0_i32_0 = arith.constant 0 : i32
    %c0_i32_1 = arith.constant 0 : i32
    %c0_i32_2 = arith.constant 0 : i32
    return %c0_i32, %c0_i32_0, %c0_i32_1 : i32, i32, i32
  }
  func.func @transform_2(%arg0: i32) -> (i32, i32, i32, i32) {
    %c0_i32 = arith.constant 0 : i32
    %c0_i32_0 = arith.constant 0 : i32
    %c0_i32_1 = arith.constant 0 : i32
    %c0_i32_2 = arith.constant 0 : i32
    %c0_i32_3 = arith.constant 0 : i32
    return %c0_i32, %c0_i32_0, %c0_i32_1, %c0_i32_2 : i32, i32, i32, i32
  }
  func.func @transform_3(%arg0: i32) -> (i32, i32) {
    %c0_i32 = arith.constant 0 : i32
    %c0_i32_0 = arith.constant 0 : i32
    %c0_i32_1 = arith.constant 0 : i32
    return %c0_i32, %c0_i32_0 : i32, i32
  }
  func.func @transform_4(%arg0: i32) -> (i32, i32, i32) {
    %c0_i32 = arith.constant 0 : i32
    %c0_i32_0 = arith.constant 0 : i32
    %c0_i32_1 = arith.constant 0 : i32
    return %arg0, %c0_i32, %c0_i32_0 : i32, i32, i32
  }
}

</mosaic_0001>

<bundles_post_ra>
// kernel: tpu_custom_call.1
= control target key start
LH: loop header
LB: loop body
LE: loop exit
PB: predicated region body
PF: predicated region fallthrough
CT: control target
= control target key end

     0   :  { %9 = vsyncpa [#allocation3], 0  ;;  %s1125_s0 = inlined_call_operand.vmem [shape: f32[2,4,16], index: 0, kind: input, shape index: {}]   ;;  %s1126_s1 = inlined_call_operand.vmem [shape: f32[3,1,32], index: 1, kind: input, shape index: {}]   ;;  %s1127_s2 = inlined_call_operand.vmem [shape: f32[3,4,8,1], index: 2, kind: input, shape index: {}]   ;;  %s1128_s3 = inlined_call_operand.vmem [shape: f32[8,1], index: 3, kind: input, shape index: {}]   ;;  %s1129_s4 = inlined_call_operand.hbm [shape: f32[2,8,32], index: 4, kind: output, shape index: {}]  }
   0x1   :  { %11 = vsyncpa [#allocation3 + $0x1], 0  ;;  %s943_s15 = smov 0   ;;  %s945_s16 = smov 0  }
   0x2   :  { %s947_s17 = smov 0   ;;  %s949_s18 = smov 0  }
   0x3 LB: > { %s964_s19 = sadd.s32 4294967295, %s891_s18   ;;  %s753_s20 = sadd.s32 4294967294, %s891_s18   ;;  %s891_s18 = sphi %s949_s18, %s1135_s18   ;;  %s887_s17 = sphi %s947_s17, %s1134_s17   ;;  %s883_s16 = sphi %s945_s16, %s1133_s16   ;;  %s879_s15 = sphi %s943_s15, %s1132_s15  }
   0x4   : > { %s968_s21 = sadd.s32 1, %s891_s18   ;;  %s113_s22 = sadd.s32 1, %s887_s17 }
   0x5   : > { %s110_s23 = ssub.s32 %s891_s18, %s968_s21  ;;  %p123_p0 = scmp.ne.s32.totalorder %s887_s17, %s883_s16 }
   0x6   : > { %p111_p1 = scmp.eq.s32.totalorder %s110_s23, 0  ;;  %p124_p2 = scmp.eq.s32.totalorder %s964_s19, 1 }
   0x7   : > { %p129_p3 = scmp.ne.s32.totalorder %s883_s16, %s879_s15  ;;  %p130_p4 = scmp.eq.s32.totalorder %s753_s20, 1 }
   0x8   : > { %s979_s24 = scalar_select %p111_p1, %s887_s17, %s113_s22  }
   0x9   : > { %p981_p5 = por %p124_p2, %p123_p0  ;;  %p985_p6 = por %p130_p4, %p129_p3 }
   0xa   : > { %p756_p7 = scmp.ge.s32.totalorder %s891_s18, 1  ;;  %p164_p8 = scmp.lt.s32.totalorder %s891_s18, 3 }
   0xc   : > { %p165_p9 = pnand %p756_p7, %p164_p8 }
   0xd   : > { %p189_p10 = scmp.lt.s32.totalorder (!%p165_p9), %s964_s19, 1  ;;  %s895_s6 = smov (!%p165_p9), 4  }
   0xe   : > { %168 = sbr.rel (%p165_p9) target bundleno = 1050 (0x41a), region = 36  ;;  %s897_s7 = smov (!%p165_p9), 2  }
   0xf   : > { %s898_s8 = smov (!%p165_p9), 8   ;;  %s899_s9 = smov (!%p165_p9), 6  }
  0x10   : > { %s900_s10 = smov (!%p165_p9), 12   ;;  %s901_s11 = smov (!%p165_p9), 10  }
  0x11   : > { %s902_s12 = smov (!%p165_p9), 16   ;;  %s903_s13 = smov (!%p165_p9), 14  }
  0x12   : > { %s904_s14 = smov (!%p165_p9), 20   ;;  %s905_s20 = smov (!%p165_p9), 18  }
  0x13   : > { %v194_v0 = vlaneseq  ;;  %s190_s27 = scalar_select %p189_p10, %s964_s19, 1  ;;  %v893_v11 = vmov 1983009808   ;;  %v894_v14 = vmov 1934713408   ;;  %v896_v40 = vmov 0.0  }
  0x14   : > { %v241_v12 = vunpack.c.l.s4 %v893_v11  ;;  %v273_v15 = vunpack.c.l.s4 %v894_v14  ;;  %s906_s22 = smov 24   ;;  %s907_s23 = smov 22   ;;  %vm434_vm0 = vcmask 15360   ;;  %vm436_vm1 = vcmask 31744  }
  0x15   : > { %v195_v1 = vshrl.u32 %v194_v0, 7  ;;  %s758_s28 = sshll.u32 %s190_s27, 2  ;;  %s908_s27 = smov 28   ;;  %vm438_vm2 = vcmask 48128   ;;  %vm440_vm3 = vcmask 64512   ;;  %vm442_vm4 = vcmask 80896  }
  0x16   : > { %s192_s5 = scalar_lea.vmem %s1125_s0, %s758_s28  ;;  %v242_v13 = vunpack.c.0.s8 %v241_v12  ;;  %v274_v20 = vunpack.c.0.s8 %v273_v15  ;;  %s909_s28 = smov 26   ;;  %vm444_vm5 = vcmask 97280   ;;  %vm446_vm6 = vcmask 113664  }
  0x17   : > { %v994_v2 = vsub.s32 2, %v195_v1  ;;  %v996_v3 = vsub.s32 0, %v195_v1  ;;  %v1001_v4 = vsub.s32 3, %v195_v1  ;;  %v1003_v5 = vsub.s32 1, %v195_v1  ;;  %v193_v6 = vld [vmem:[%s192_s5] sm:$0xf] }
  0x18   : > { %v245_v18 = vsub.s32 %v242_v13, %v195_v1  ;;  %v277_v29 = vsub.s32 %v274_v20, %v195_v1  ;;  %s910_s29 = smov 30   ;;  %vm448_vm7 = vcmask 130048   ;;  %vm450_vm8 = vcmask 146432   ;;  %s911_s30 = smov 32  }
  0x19   : > { %v219_v7 = vrot.slane %v193_v6, %v994_v2  ;;  %v197_v8 = vrot.slane %v193_v6, %v996_v3  ;;  %v230_v9 = vrot.slane %v193_v6, %v1001_v4  ;;  %v208_v10 = vrot.slane %v193_v6, %v1003_v5  ;;  %s912_s5 = smov 126  }
  0x1a   : > { %vm452_vm9 = vcmask 162816   ;;  %vm454_vm10 = vcmask 179200   ;;  %vm456_vm11 = vcmask 195584   ;;  %vm458_vm12 = vcmask 211968  }
  0x1b   : > { %221 = vbcast.lane.b32.xlu1 %v219_v7, 256  ;;  %199 = vbcast.lane.b32.xlu0 %v197_v8, 256  ;;  %vm460_vm13 = vcmask 228352   ;;  %vm462_vm14 = vcmask 244736   ;;  %vm467_vm15 = vcmask 1047808  }
  0x1f   : > { %232 = vbcast.lane.b32.xlu1 %v230_v9, 256  ;;  %210 = vbcast.lane.b32.xlu0 %v208_v10, 256 }
  0x23   : > { %214 = vbcast.lane.b32.xlu1 %v208_v10, 264  ;;  %203 = vbcast.lane.b32.xlu0 %v197_v8, 264 }
  0x27   : > { %236 = vbcast.lane.b32.xlu1 %v230_v9, 264  ;;  %225 = vbcast.lane.b32.xlu0 %v219_v7, 264 }
  0x8d   : > { %v222_v16 = vpop.permute.xlu1 %221  ;;  %v200_v17 = vpop.permute.xlu0 %199 }
  0x8e   : > { %v238_v19 = vcombine.low %v200_v17, %v222_v16  ;;  %v239_v23 = vcombine.high %v200_v17, %v222_v16 }
  0x90   : > { %v246_v26 = vrot.slane %v238_v19, %v245_v18  ;;  %v253_v32 = vrot.slane %v239_v23, %v245_v18 }
  0x91   : > { %v233_v21 = vpop.permute.xlu1 %232  ;;  %v211_v22 = vpop.permute.xlu0 %210 }
  0x92   : > { %v254_v24 = vcombine.low %v211_v22, %v233_v21  ;;  %v255_v25 = vcombine.high %v211_v22, %v233_v21 }
  0x94   : > { %v262_v27 = vrot.slane %v254_v24, %v245_v18  ;;  %v269_v28 = vrot.slane %v255_v25, %v245_v18 }
  0x95   : > { %v215_v30 = vpop.permute.xlu1 %214  ;;  %v204_v31 = vpop.permute.xlu0 %203 }
  0x96   : > { %v270_v33 = vcombine.low %v246_v26, %v262_v27  ;;  %v271_v34 = vcombine.high %v246_v26, %v262_v27  ;;  %v286_v35 = vcombine.low %v253_v32, %v269_v28  ;;  %v287_v44 = vcombine.high %v253_v32, %v269_v28 }
  0x98   : > { %v285_v36 = vrot.slane %v271_v34, %v277_v29  ;;  %v1009_v37 = vrot.slane %v270_v33, %v277_v29  ;;  %v294_v47 = vrot.slane %v286_v35, %v277_v29  ;;  %v301_v52 = vrot.slane %v287_v44, %v277_v29  ;;  %v759_v44 = vld [vmem:[%s1126_s1] ss:$0 sm:$0xff] }
  0x99   : > { %v237_v38 = vpop.permute.xlu1 %236  ;;  %v226_v39 = vpop.permute.xlu0 %225 }
  0x9a   : > { %379 = vrot.lane.b32.xlu1 %v285_v36, %s895_s6  ;;  %v302_v41 = vcombine.high %v1009_v37, %v896_v40  ;;  %v322_v42 = vcombine.low %v215_v30, %v237_v38  ;;  %v306_v43 = vcombine.low %v204_v31, %v226_v39  ;;  %v303_v49 = vcombine.high %v285_v36, %v896_v40  ;;  %s913_s6 = smov 98  }
  0x9b   : > { %v323_v50 = vcombine.high %v215_v30, %v237_v38  ;;  %v307_v51 = vcombine.high %v204_v31, %v226_v39  ;;  %v304_v53 = vcombine.high %v294_v47, %v896_v40  ;;  %v305_v58 = vcombine.high %v301_v52, %v896_v40 }
  0x9c   : > { %375 = vrot.lane.b32.xlu0 %v302_v41, %s897_s7  ;;  %v330_v45 = vrot.slane %v322_v42, %v245_v18  ;;  %v314_v46 = vrot.slane %v306_v43, %v245_v18  ;;  %v914_v43 = vmov 0  }
  0x9d   : > { %v337_v55 = vrot.slane %v323_v50, %v245_v18  ;;  %v321_v56 = vrot.slane %v307_v51, %v245_v18  ;;  %830 = vset.pattern.permute.xlu0 %v914_v43  ;;  %829 = vset.pattern.permute.xlu1 %v914_v43 }
  0x9e   : > { %v338_v48 = vcombine.low %v314_v46, %v330_v45  ;;  %387 = vrot.lane.b32.xlu1 %v294_v47, %s898_s8  ;;  %v339_v57 = vcombine.high %v314_v46, %v330_v45  ;;  %v760_v45 = vld [vmem:[%s1126_s1 + $0x1] ss:$0 sm:$0xff]  ;;  %v761_v46 = vld [vmem:[%s1126_s1 + $0x2] ss:$0 sm:$0xff]  ;;  %s186_s8 = sand.u32 1, %s883_s16  }
  0x9f   : > { %v354_v59 = vcombine.low %v321_v56, %v337_v55  ;;  %v355_v62 = vcombine.high %v321_v56, %v337_v55  ;;  %v529_v55 = vld [vmem:[%s1127_s2 + $0x10] sm:$0xff] }
  0xa0   : > { %383 = vrot.lane.b32.xlu0 %v303_v49, %s899_s9  ;;  %v346_v54 = vrot.slane %v338_v48, %v277_v29  ;;  %v353_v60 = vrot.slane %v339_v57, %v277_v29  ;;  %s916_s9 = smov 97  }
  0xa1   : > { %v362_v63 = vrot.slane %v354_v59, %v277_v29  ;;  %v369_v6 = vrot.slane %v355_v62, %v277_v29  ;;  %v530_v59 = vld [vmem:[%s1127_s2 + $0x18] sm:$0xff] }
  0xa2   : > { %395 = vrot.lane.b32.xlu1 %v301_v52, %s900_s10  ;;  %v370_v61 = vcombine.high %v346_v54, %v896_v40  ;;  %v371_v1 = vcombine.high %v353_v60, %v896_v40 }
  0xa3   : > { %v372_v7 = vcombine.high %v362_v63, %v896_v40  ;;  %v373_v8 = vcombine.high %v369_v6, %v896_v40 }
  0xa4   : > { %391 = vrot.lane.b32.xlu0 %v304_v53, %s901_s11 }
  0xa6   : > { %403 = vrot.lane.b32.xlu1 %v346_v54, %s902_s12  ;;  %v527_v54 = vld [vmem:[%s1127_s2] sm:$0xff] }
  0xa8   : > { %399 = vrot.lane.b32.xlu0 %v305_v58, %s903_s13  ;;  %v528_v58 = vld [vmem:[%s1127_s2 + $0x8] sm:$0xff] }
  0xaa   : > { %411 = vrot.lane.b32.xlu1 %v353_v60, %s904_s14  ;;  %v532_v60 = vld [vmem:[%s1127_s2 + $0x28] sm:$0xff] }
  0xac   : > { %407 = vrot.lane.b32.xlu0 %v370_v61, %s905_s20  ;;  %v534_v61 = vld [vmem:[%s1127_s2 + $0x38] sm:$0xff]  ;;  %s681_s20 = scalar_lea.sflag [#allocation3], %s186_s8 }
  0xae   : > { %419 = vrot.lane.b32.xlu1 %v362_v63, %s906_s22 }
  0xb0   : > { %415 = vrot.lane.b32.xlu0 %v371_v1, %s907_s23  ;;  %v537_v1 = vld [vmem:[%s1127_s2 + $0x50] sm:$0xff]  ;;  %s917_s23 = smov [#allocation2]  }
  0xb2   : > { %427 = vrot.lane.b32.xlu1 %v369_v6, %s908_s27  ;;  %v531_v6 = vld [vmem:[%s1127_s2 + $0x20] sm:$0xff]  ;;  %s835_s27 = sshll.u32 %s917_s23, 4  ;;  %s836_s27 = int_to_ptr.vmem [resolvable:$false] %s835_s27 }
  0xb4   : > { %423 = vrot.lane.b32.xlu0 %v372_v7, %s909_s28  ;;  %v539_v7 = vld [vmem:[%s1128_s3] sm:$0xff] }
  0xb8   : > { %431 = vrot.lane.b32.xlu0 %v373_v8, %s910_s29  ;;  %v533_v8 = vld [vmem:[%s1127_s2 + $0x30] sm:$0xff] }
 0x10c   : > { %v380_v9 = vpop.permute.xlu1 %379 }
 0x10e   : > { %v376_v10 = vpop.permute.xlu0 %375 }
 0x10f   : > { %v435_v11 = vsel %vm434_vm0, %v1009_v37, %v376_v10  ;;  %v536_v10 = vld [vmem:[%s1127_s2 + $0x48] sm:$0xff] }
 0x110   : > { %v388_v12 = vpop.permute.xlu1 %387  ;;  %v437_v13 = vsel %vm436_vm1, %v435_v11, %v380_v9  ;;  %v535_v9 = vld [vmem:[%s1127_s2 + $0x40] sm:$0xff]  ;;  %v538_v11 = vld [vmem:[%s1127_s2 + $0x58] sm:$0xff] }
 0x112   : > { %v384_v14 = vpop.permute.xlu0 %383 }
 0x113   : > { %v439_v15 = vsel %vm438_vm2, %v437_v13, %v384_v14  ;;  %vm678_vm2 = vcmask 261120  }
 0x114   : > { %v396_v16 = vpop.permute.xlu1 %395  ;;  %v441_v17 = vsel %vm440_vm3, %v439_v15, %v388_v12  ;;  %v505_v15 = vand.u32 127, %v194_v0 }
 0x116   : > { %v392_v18 = vpop.permute.xlu0 %391  ;;  %vm506_vm0 = vcmp.gt.s32.totalorder %v505_v15, 0  ;;  %vm520_vm1 = vcmp.lt.s32.totalorder %v505_v15, 31 }
 0x117   : > { %v443_v19 = vsel %vm442_vm4, %v441_v17, %v392_v18 }
 0x118   : > { %v404_v20 = vpop.permute.xlu1 %403  ;;  %v445_v21 = vsel %vm444_vm5, %v443_v19, %v396_v16 }
 0x11a   : > { %v400_v22 = vpop.permute.xlu0 %399 }
 0x11b   : > { %v447_v23 = vsel %vm446_vm6, %v445_v21, %v400_v22 }
 0x11c   : > { %v412_v24 = vpop.permute.xlu1 %411  ;;  %v449_v25 = vsel %vm448_vm7, %v447_v23, %v404_v20 }
 0x11e   : > { %v408_v26 = vpop.permute.xlu0 %407 }
 0x11f   : > { %v451_v27 = vsel %vm450_vm8, %v449_v25, %v408_v26 }
 0x120   : > { %v453_v28 = vsel %vm452_vm9, %v451_v27, %v412_v24  ;;  %v420_v30 = vpop.permute.xlu1 %419 }
 0x122   : > { %v416_v29 = vpop.permute.xlu0 %415 }
 0x123   : > { %v455_v31 = vsel %vm454_vm10, %v453_v28, %v416_v29 }
 0x124   : > { %v457_v32 = vsel %vm456_vm11, %v455_v31, %v420_v30  ;;  %v428_v35 = vpop.permute.xlu1 %427 }
 0x126   : > { %v424_v33 = vpop.permute.xlu0 %423 }
 0x127   : > { %v459_v34 = vsel %vm458_vm12, %v457_v32, %v424_v33 }
 0x128   : > { %v461_v36 = vsel %vm460_vm13, %v459_v34, %v428_v35 }
 0x12a   : > { %v432_v37 = vpop.permute.xlu0 %431 }
 0x12b   : > { %v463_v38 = vsel %vm462_vm14, %v461_v36, %v432_v37 }
 0x12c   : > { %468 = vrot.lane.b32.xlu1 %v463_v38, %s911_s30  ;;  %v491_v50 = vmul.f32 %v760_v45, %v463_v38 }
 0x19e   : > { %v469_v39 = vpop.permute.xlu1 %468 }
 0x19f   : > { %v470_v40 = vsel %vm467_vm15, %v469_v39, %v463_v38 }
 0x1a0   : > { %471 = vrot.lane.b32.xlu0 %v470_v40, %s911_s30 }
 0x212   : > { %v472_v41 = vpop.permute.xlu0 %471 }
 0x213   : > { %v473_v42 = vsel %vm467_vm15, %v472_v41, %v463_v38 }
 0x214   : > { %499 = vrot.lane.b32.xlu0 %v473_v42, %s912_s5  ;;  %481 = vrot.lane.b32.xlu1 %v473_v42, %s913_s6 }
 0x286   : > { %v500_v47 = vpop.permute.xlu0 %499  ;;  %v482_v48 = vpop.permute.xlu1 %481 }
 0x287   : > { %v484_v49 = vmul.f32 %v759_v44, %v482_v48  ;;  %v502_v51 = vmul.f32 %v761_v46, %v500_v47 }
 0x289   : > { %v492_v52 = vadd.f32 %v491_v50, %v484_v49 }
 0x28b   : > { %v1026_v53 = vadd.f32 %v502_v51, %v492_v52 }
 0x28d   : > { %507 = vrot.lane.b32.xlu1 %v1026_v53, %s911_s30  ;;  %v591_v30 = vrot.slane %v1026_v53, %v996_v3  ;;  %v602_v32 = vrot.slane %v1026_v53, %v1003_v5  ;;  %v613_v38 = vrot.slane %v1026_v53, %v994_v2  ;;  %v624_v41 = vrot.slane %v1026_v53, %v1001_v4 }
 0x291   : > { %542 = vperm.xlu1 %829, %v527_v54  }
 0x295   : > { %563 = vperm.xlu1 %829, %v529_v55  }
 0x2ff   : > { %v508_v56 = vpop.permute.xlu1 %507 }
 0x300   : > { %v509_v57 = vsel %vm467_vm15, %v508_v56, %v1026_v53 }
 0x301   : > { %510 = vrot.lane.b32.xlu0 %v509_v57, %s911_s30  ;;  %s915_s30 = smov 127  }
 0x305   : > { %552 = vperm.xlu0 %830, %v528_v58  }
 0x309   : > { %574 = vperm.xlu0 %830, %v530_v59  }
 0x30c   : > { %v543_v12 = vpop.permute.xlu1 %542 }
 0x30d   : > { %596 = vperm.xlu0 %830, %v532_v60  }
 0x310   : > { %v564_v14 = vpop.permute.xlu1 %563 }
 0x311   : > { %618 = vperm.xlu0 %830, %v534_v61  }
 0x373   : > { %v511_v62 = vpop.permute.xlu0 %510 }
 0x374   : > { %v512_v63 = vsel %vm467_vm15, %v511_v62, %v1026_v53 }
 0x375   : > { %523 = vrot.lane.b32.xlu0 %v512_v63, %s915_s30  ;;  %516 = vrot.lane.b32.xlu1 %v512_v63, %s916_s9  ;;  %s757_s30 = sshll.u32 %s186_s8, 3  ;;  %s763_s9 = sshll.u32 %s964_s19, 7 }
 0x376   : > { %s188_s10 = scalar_lea.vmem [#allocation2], %s757_s30  ;;  %s692_s14 = scalar_lea.hbm %s1129_s4, %s763_s9 }
 0x377   : > { %s694_s11 = sshll.u32 %s188_s10, 4  ;;  %s837_s19 = scalar_lea.vmem %s836_s27, 256  ;;  %s695_s11 = int_to_ptr.vmem [resolvable:$true] %s694_s11 }
 0x378   : > { %s831_s22 = scalar_lea.vmem %s695_s11, 128  ;;  %p838_p0 = scmp.lt.s32.totalorder %s695_s11, %s836_s27 }
 0x379   : > { %651 = vperm.xlu0 %830, %v537_v1   ;;  %585 = vperm.xlu1 %829, %v531_v6   ;;  %p832_p11 = scmp.ne.s32.totalorder %s695_s11, %s831_s22  ;;  %p839_p1 = scmp.lt.s32.totalorder %s837_s19, %s831_s22 }
 0x37b   : > { %p833_p12 = pnand %p832_p11, %p981_p5  ;;  %p840_p2 = por %p839_p1, %p838_p0 }
 0x37d   : > { %673 = vperm.xlu0 %830, %v539_v7   ;;  %607 = vperm.xlu1 %829, %v533_v8   ;;  %p834_p13 = pneg %p833_p12 }
 0x37f   : > { %p841_p3 = pnand %p840_p2, %p834_p13 }
 0x380   : > { %v553_v13 = vpop.permute.xlu0 %552 }
 0x381   : > { %629 = vperm.xlu1 %829, %v535_v9  }
 0x384   : > { %v575_v16 = vpop.permute.xlu0 %574 }
 0x385   : > { %640 = vperm.xlu1 %829, %v536_v10  }
 0x388   : > { %v597_v21 = vpop.permute.xlu0 %596 }
 0x389   : > { %662 = vperm.xlu1 %829, %v538_v11   ;;  %v603_v36 = vmul.f32 %v602_v32, %v597_v21 }
 0x38c   : > { %v619_v28 = vpop.permute.xlu0 %618 }
 0x38d   : > { %v625_v44 = vmul.f32 %v624_v41, %v619_v28 }
 0x3e7   : > { %v517_v17 = vpop.permute.xlu1 %516  ;;  %v524_v33 = vpop.permute.xlu0 %523 }
 0x3e8   : > { %v519_v18 = vsel %vm506_vm0, %v517_v17, 0.0  ;;  %v526_v39 = vsel %vm520_vm1, %v524_v33, 0.0 }
 0x3e9   : > { %v548_v19 = vrot.slane %v519_v18, %v996_v3  ;;  %v558_v20 = vrot.slane %v519_v18, %v1003_v5  ;;  %v569_v24 = vrot.slane %v519_v18, %v994_v2  ;;  %v580_v27 = vrot.slane %v519_v18, %v1001_v4 }
 0x3ea   : > { %v635_v46 = vrot.slane %v526_v39, %v996_v3  ;;  %v646_v50 = vrot.slane %v526_v39, %v1003_v5  ;;  %v657_v54 = vrot.slane %v526_v39, %v994_v2  ;;  %v668_v58 = vrot.slane %v526_v39, %v1001_v4 }
 0x3eb   : > { %v549_v22 = vmul.f32 %v548_v19, %v543_v12  ;;  %v559_v23 = vmul.f32 %v558_v20, %v553_v13  ;;  %v570_v26 = vmul.f32 %v569_v24, %v564_v14  ;;  %v581_v0 = vmul.f32 %v580_v27, %v575_v16 }
 0x3ed   : > { %v560_v25 = vadd.f32 %v559_v23, %v549_v22 }
 0x3ef   : > { %v571_v29 = vadd.f32 %v570_v26, %v560_v25 }
 0x3f1   : > { %v582_v34 = vadd.f32 %v581_v0, %v571_v29 }
 0x3f4   : > { %v586_v31 = vpop.permute.xlu1 %585  ;;  %v652_v51 = vpop.permute.xlu0 %651 }
 0x3f5   : > { %v592_v35 = vmul.f32 %v591_v30, %v586_v31  ;;  %v658_v53 = vmul.f32 %v657_v54, %v652_v51 }
 0x3f7   : > { %v593_v37 = vadd.f32 %v592_v35, %v582_v34 }
 0x3f8   : > { %v608_v40 = vpop.permute.xlu1 %607  ;;  %v674_v62 = vpop.permute.xlu0 %673 }
 0x3f9   : > { %v604_v42 = vadd.f32 %v603_v36, %v593_v37  ;;  %v614_v43 = vmul.f32 %v613_v38, %v608_v40 }
 0x3fb   : > { %v615_v45 = vadd.f32 %v614_v43, %v604_v42 }
 0x3fc   : > { %v630_v47 = vpop.permute.xlu1 %629 }
 0x3fd   : > { %v626_v48 = vadd.f32 %v625_v44, %v615_v45  ;;  %v636_v49 = vmul.f32 %v635_v46, %v630_v47 }
 0x3ff   : > { %v637_v55 = vadd.f32 %v636_v49, %v626_v48 }
 0x400   : > { %v641_v52 = vpop.permute.xlu1 %640 }
 0x401   : > { %v647_v56 = vmul.f32 %v646_v50, %v641_v52 }
 0x403   : > { %v648_v57 = vadd.f32 %v647_v56, %v637_v55 }
 0x404   : > { %v663_v59 = vpop.permute.xlu1 %662 }
 0x405   : > { %v659_v3 = vadd.f32 %v658_v53, %v648_v57  ;;  %v669_v60 = vmul.f32 %v668_v58, %v663_v59 }
 0x407   : > { %v670_v61 = vadd.f32 %v669_v60, %v659_v3 }
 0x409   : > { %v676_v5 = vadd.f32 %v674_v62, %v670_v61 }
 0x40b   : > { %v677_v63 = vmax.f32 %v676_v5, 0.0 }
 0x40d   : > { %679 = vst.msk [vmem:[%s188_s10] sm:$0xff] %vm678_vm2, %v677_v63 }
 0x40e   : > { %844 = shalt.err (!%p841_p3)
}
 0x40f   : > { %s845_s28 = scalar_lea.hbm %s692_s14, 128  ;;  %s849_s6 = scalar_lea.hbm %s1129_s4, 256 }
 0x410   : > { %p846_p4 = scmp.ne.s32.totalorder %s692_s14, %s845_s28  ;;  %p850_p9 = scmp.lt.s32.totalorder %s692_s14, %s1129_s4 }
 0x411   : > { %p851_p10 = scmp.lt.s32.totalorder %s849_s6, %s845_s28 }
 0x412   : > { %p847_p7 = pnand %p846_p4, %p981_p5 }
 0x413   : > { %p852_p11 = por %p851_p10, %p850_p9 }
 0x414   : > { %p848_p8 = pneg %p847_p7 }
 0x416   : > { %p853_p12 = pnand %p852_p11, %p848_p8 }
 0x418   : > { %856 = shalt.err (!%p853_p12)
}
 0x419   : > { %766 = dma.vmem_to_hbm [thread:$0]  (%p981_p5), %s695_s11, 128, %s692_s14, %s681_s20  }
 0x41a PF: > { %p772_p13 = scmp.ge.s32.totalorder %s891_s18, 2  ;;  %s706_s30 = sand.u32 1, %s879_s15  }
 0x41b   : > { %s707_s9 = scalar_lea.sflag [#allocation3], %s706_s30 }
 0x41c   : > { %p769_p0 = pnand %p772_p13, %p985_p6 }
 0x41e   : > { %p770_p1 = pneg %p769_p0 }
 0x420   : > { %874 = dma.done.wait (%p770_p1), %s707_s9, 128  }
 0x421   : > { %876 = vsyncadd (%p770_p1), %s707_s9, 4294967168  ;;  %p14_p2 = scmp.ge.s32.totalorder %s968_s21, 4   ;;  %s1132_s15 = smov %s883_s16 }
 0x422   : > { %s1133_s16 = smov %s887_s17  ;;  %s1134_s17 = smov %s979_s24 }
 0x423   : > { %s1135_s18 = smov %s968_s21  ;;  %16 = sbr.rel (!%p14_p2) target bundleno = 3 (0x3), region = 71 }
 0x428   :  { %712 = vsyncpa [#allocation3], 1 }
 0x429   :  { %714 = vsyncpa [#allocation3 + $0x1], 1 }

// kernel: tpu_custom_call.1
= control target key start
LH: loop header
LB: loop body
LE: loop exit
PB: predicated region body
PF: predicated region fallthrough
CT: control target
= control target key end

     0   :  { %9 = vsyncpa [#allocation3], 0  ;;  %s789_s0 = inlined_call_operand.vmem [shape: f32[2,4,32], index: 0, kind: input, shape index: {}]   ;;  %s790_s1 = inlined_call_operand.vmem [shape: f32[3,1,32], index: 1, kind: input, shape index: {}]   ;;  %s791_s2 = inlined_call_operand.vmem [shape: f32[3,4,8,1], index: 2, kind: input, shape index: {}]   ;;  %s792_s3 = inlined_call_operand.vmem [shape: f32[8,1], index: 3, kind: input, shape index: {}]   ;;  %s793_s4 = inlined_call_operand.hbm [shape: f32[2,8,32], index: 4, kind: output, shape index: {}]  }
   0x1   :  { %11 = vsyncpa [#allocation3 + $0x1], 0  ;;  %s637_s15 = smov 0   ;;  %s639_s16 = smov 0  }
   0x2   :  { %s641_s17 = smov 0   ;;  %s643_s18 = smov 0  }
   0x3 LB: > { %s658_s19 = sadd.s32 4294967295, %s603_s18   ;;  %s483_s20 = sadd.s32 4294967294, %s603_s18   ;;  %s603_s18 = sphi %s643_s18, %s799_s18   ;;  %s599_s17 = sphi %s641_s17, %s798_s17   ;;  %s595_s16 = sphi %s639_s16, %s797_s16   ;;  %s591_s15 = sphi %s637_s15, %s796_s15  }
   0x4   : > { %s662_s21 = sadd.s32 1, %s603_s18   ;;  %s113_s22 = sadd.s32 1, %s599_s17 }
   0x5   : > { %s110_s23 = ssub.s32 %s603_s18, %s662_s21  ;;  %p123_p0 = scmp.ne.s32.totalorder %s599_s17, %s595_s16 }
   0x6   : > { %p111_p1 = scmp.eq.s32.totalorder %s110_s23, 0  ;;  %p124_p2 = scmp.eq.s32.totalorder %s658_s19, 1 }
   0x7   : > { %p129_p3 = scmp.ne.s32.totalorder %s595_s16, %s591_s15  ;;  %p130_p4 = scmp.eq.s32.totalorder %s483_s20, 1 }
   0x8   : > { %s673_s24 = scalar_select %p111_p1, %s599_s17, %s113_s22  }
   0x9   : > { %p675_p5 = por %p124_p2, %p123_p0  ;;  %p679_p6 = por %p130_p4, %p129_p3 }
   0xa   : > { %p486_p7 = scmp.ge.s32.totalorder %s603_s18, 1  ;;  %p164_p8 = scmp.lt.s32.totalorder %s603_s18, 3 }
   0xc   : > { %p165_p9 = pnand %p486_p7, %p164_p8 }
   0xd   : > { %p189_p10 = scmp.lt.s32.totalorder (!%p165_p9), %s658_s19, 1  ;;  %s605_s6 = smov (!%p165_p9), 32  }
   0xe   : > { %168 = sbr.rel (%p165_p9) target bundleno = 777 (0x309), region = 36  ;;  %s607_s7 = smov (!%p165_p9), 98  }
   0xf   : > { %s608_s8 = smov (!%p165_p9), 126   ;;  %s609_s23 = smov (!%p165_p9), 97  }
  0x10   : > { %s610_s30 = smov (!%p165_p9), 127   ;;  %s186_s10 = sand.u32 (!%p165_p9), 1, %s595_s16  }
  0x11   : > { %s487_s11 = sshll.u32 (!%p165_p9), %s186_s10, 3  ;;  %s493_s12 = sshll.u32 (!%p165_p9), %s658_s19, 7 }
  0x12   : > { %s188_s13 = scalar_lea.vmem (!%p165_p9), [#allocation2], %s487_s11 }
  0x13   : > { %s190_s27 = scalar_select %p189_p10, %s658_s19, 1  ;;  %vm197_vm0 = vcmask 1047808   ;;  %v606_v3 = vmov 0   ;;  %v489_v6 = vld [vmem:[%s790_s1] ss:$0 sm:$0xff]  ;;  %v259_v17 = vld [vmem:[%s791_s2 + $0x10] sm:$0xff]  ;;  %v234_v34 = vlaneseq }
  0x14   : > { %541 = vset.pattern.permute.xlu0 %v606_v3  ;;  %542 = vset.pattern.permute.xlu1 %v606_v3  ;;  %v490_v7 = vld [vmem:[%s790_s1 + $0x1] ss:$0 sm:$0xff]  ;;  %v491_v11 = vld [vmem:[%s790_s1 + $0x2] ss:$0 sm:$0xff]  ;;  %v263_v19 = vld [vmem:[%s791_s2 + $0x30] sm:$0xff]  ;;  %s424_s14 = sshll.u32 %s188_s13, 4  ;;  %s425_s14 = int_to_ptr.vmem [resolvable:$true] %s424_s14 }
  0x15   : > { %s488_s28 = sshll.u32 %s190_s27, 2  ;;  %v257_v16 = vld [vmem:[%s791_s2] sm:$0xff]  ;;  %v266_v21 = vld [vmem:[%s791_s2 + $0x48] sm:$0xff]  ;;  %v268_v22 = vld [vmem:[%s791_s2 + $0x58] sm:$0xff]  ;;  %v235_v36 = vand.u32 127, %v234_v34  ;;  %v276_v38 = vshrl.u32 %v234_v34, 7 }
  0x16   : > { %s192_s5 = scalar_lea.vmem %s789_s0, %s488_s28  ;;  %v261_v18 = vld [vmem:[%s791_s2 + $0x20] sm:$0xff]  ;;  %v258_v25 = vld [vmem:[%s791_s2 + $0x8] sm:$0xff]  ;;  %v260_v26 = vld [vmem:[%s791_s2 + $0x18] sm:$0xff]  ;;  %vm408_vm3 = vcmask 261120   ;;  %s411_s27 = scalar_lea.sflag [#allocation3], %s186_s10 }
  0x17   : > { %v193_v0 = vld [vmem:[%s192_s5] sm:$0xf]  ;;  %v262_v29 = vld [vmem:[%s791_s2 + $0x28] sm:$0xff]  ;;  %v264_v30 = vld [vmem:[%s791_s2 + $0x38] sm:$0xff]  ;;  %vm236_vm1 = vcmp.gt.s32.totalorder %v235_v36, 0  ;;  %v277_v39 = vsub.s32 0, %v276_v38 }
  0x18   : > { %198 = vrot.lane.b32.xlu0 %v193_v0, %s605_s6  ;;  %v221_v10 = vmul.f32 %v490_v7, %v193_v0  ;;  %v265_v20 = vld [vmem:[%s791_s2 + $0x40] sm:$0xff]  ;;  %v267_v31 = vld [vmem:[%s791_s2 + $0x50] sm:$0xff]  ;;  %v298_v40 = vsub.s32 2, %v276_v38  ;;  %v287_v41 = vsub.s32 1, %v276_v38  ;;  %v309_v48 = vsub.s32 3, %v276_v38  ;;  %s543_s28 = scalar_lea.vmem %s425_s14, 128 }
  0x19   : > { %v269_v32 = vld [vmem:[%s792_s3] sm:$0xff]  ;;  %vm250_vm2 = vcmp.lt.s32.totalorder %v235_v36, 31  ;;  %p544_p11 = scmp.ne.s32.totalorder %s425_s14, %s543_s28 }
  0x1b   : > { %p545_p12 = pnand %p544_p11, %p675_p5 }
  0x1d   : > { %p546_p13 = pneg %p545_p12 }
  0x8a   : > { %v199_v1 = vpop.permute.xlu0 %198 }
  0x8b   : > { %v200_v2 = vsel %vm197_vm0, %v199_v1, %v193_v0 }
  0x8c   : > { %201 = vrot.lane.b32.xlu0 %v200_v2, %s605_s6 }
  0xfe   : > { %v202_v4 = vpop.permute.xlu0 %201 }
  0xff   : > { %v203_v5 = vsel %vm197_vm0, %v202_v4, %v193_v0 }
 0x100   : > { %211 = vrot.lane.b32.xlu1 %v203_v5, %s607_s7 }
 0x104   : > { %229 = vrot.lane.b32.xlu1 %v203_v5, %s608_s8 }
 0x172   : > { %v212_v8 = vpop.permute.xlu1 %211 }
 0x173   : > { %v214_v9 = vmul.f32 %v489_v6, %v212_v8 }
 0x175   : > { %v222_v13 = vadd.f32 %v221_v10, %v214_v9 }
 0x176   : > { %v230_v12 = vpop.permute.xlu1 %229 }
 0x177   : > { %v232_v14 = vmul.f32 %v491_v11, %v230_v12 }
 0x179   : > { %v703_v15 = vadd.f32 %v232_v14, %v222_v13 }
 0x17b   : > { %237 = vrot.lane.b32.xlu0 %v703_v15, %s605_s6  ;;  %v321_v57 = vrot.slane %v703_v15, %v277_v39  ;;  %v332_v59 = vrot.slane %v703_v15, %v287_v41  ;;  %v343_v1 = vrot.slane %v703_v15, %v298_v40  ;;  %v354_v6 = vrot.slane %v703_v15, %v309_v48 }
 0x17f   : > { %272 = vperm.xlu0 %541, %v257_v16  }
 0x183   : > { %293 = vperm.xlu0 %541, %v259_v17  }
 0x187   : > { %315 = vperm.xlu0 %541, %v261_v18  }
 0x18b   : > { %337 = vperm.xlu0 %541, %v263_v19  }
 0x18f   : > { %359 = vperm.xlu0 %541, %v265_v20  }
 0x193   : > { %370 = vperm.xlu0 %541, %v266_v21  }
 0x197   : > { %392 = vperm.xlu0 %541, %v268_v22  }
 0x1ed   : > { %v238_v23 = vpop.permute.xlu0 %237 }
 0x1ee   : > { %v239_v24 = vsel %vm197_vm0, %v238_v23, %v703_v15 }
 0x1ef   : > { %240 = vrot.lane.b32.xlu1 %v239_v24, %s605_s6  ;;  %s611_s6 = smov [#allocation2]  }
 0x1f0   : > { %s547_s29 = sshll.u32 %s611_s6, 4  ;;  %s548_s29 = int_to_ptr.vmem [resolvable:$false] %s547_s29 }
 0x1f1   : > { %s549_s19 = scalar_lea.vmem %s548_s29, 256  ;;  %p550_p0 = scmp.lt.s32.totalorder %s425_s14, %s548_s29 }
 0x1f2   : > { %p551_p1 = scmp.lt.s32.totalorder %s549_s19, %s543_s28 }
 0x1f3   : > { %282 = vperm.xlu1 %542, %v258_v25  }
 0x1f4   : > { %p552_p2 = por %p551_p1, %p550_p0 }
 0x1f6   : > { %p553_p3 = pnand %p552_p2, %p546_p13 }
 0x1f7   : > { %304 = vperm.xlu1 %542, %v260_v26  }
 0x1fa   : > { %v273_v37 = vpop.permute.xlu0 %272 }
 0x1fe   : > { %v294_v44 = vpop.permute.xlu0 %293 }
 0x202   : > { %v316_v54 = vpop.permute.xlu0 %315 }
 0x203   : > { %v322_v60 = vmul.f32 %v321_v57, %v316_v54 }
 0x206   : > { %v338_v62 = vpop.permute.xlu0 %337 }
 0x207   : > { %v344_v5 = vmul.f32 %v343_v1, %v338_v62 }
 0x20a   : > { %v360_v4 = vpop.permute.xlu0 %359 }
 0x20e   : > { %v371_v13 = vpop.permute.xlu0 %370 }
 0x212   : > { %v393_v23 = vpop.permute.xlu0 %392 }
 0x261   : > { %v241_v27 = vpop.permute.xlu1 %240 }
 0x262   : > { %v242_v28 = vsel %vm197_vm0, %v241_v27, %v703_v15 }
 0x263   : > { %246 = vrot.lane.b32.xlu1 %v242_v28, %s609_s23  ;;  %s422_s23 = scalar_lea.hbm %s793_s4, %s493_s12 }
 0x267   : > { %326 = vperm.xlu1 %542, %v262_v29  }
 0x26b   : > { %348 = vperm.xlu1 %542, %v264_v30  }
 0x26e   : > { %v283_v33 = vpop.permute.xlu1 %282 }
 0x26f   : > { %253 = vrot.lane.b32.xlu1 %v242_v28, %s610_s30 }
 0x272   : > { %v305_v35 = vpop.permute.xlu1 %304 }
 0x273   : > { %381 = vperm.xlu1 %542, %v267_v31  }
 0x277   : > { %403 = vperm.xlu1 %542, %v269_v32  }
 0x2d5   : > { %v247_v42 = vpop.permute.xlu1 %246 }
 0x2d6   : > { %v249_v43 = vsel %vm236_vm1, %v247_v42, 0.0 }
 0x2d7   : > { %v278_v45 = vrot.slane %v249_v43, %v277_v39  ;;  %v288_v46 = vrot.slane %v249_v43, %v287_v41  ;;  %v299_v47 = vrot.slane %v249_v43, %v298_v40  ;;  %v310_v51 = vrot.slane %v249_v43, %v309_v48 }
 0x2d9   : > { %v279_v49 = vmul.f32 %v278_v45, %v273_v37  ;;  %v289_v50 = vmul.f32 %v288_v46, %v283_v33  ;;  %v300_v53 = vmul.f32 %v299_v47, %v294_v44  ;;  %v311_v56 = vmul.f32 %v310_v51, %v305_v35 }
 0x2db   : > { %v290_v52 = vadd.f32 %v289_v50, %v279_v49 }
 0x2dd   : > { %v301_v55 = vadd.f32 %v300_v53, %v290_v52 }
 0x2df   : > { %v312_v58 = vadd.f32 %v311_v56, %v301_v55 }
 0x2e1   : > { %v323_v0 = vadd.f32 %v322_v60, %v312_v58 }
 0x2e2   : > { %v327_v61 = vpop.permute.xlu1 %326 }
 0x2e3   : > { %v333_v63 = vmul.f32 %v332_v59, %v327_v61 }
 0x2e5   : > { %v334_v2 = vadd.f32 %v333_v63, %v323_v0 }
 0x2e6   : > { %v349_v3 = vpop.permute.xlu1 %348 }
 0x2e7   : > { %v345_v7 = vadd.f32 %v344_v5, %v334_v2  ;;  %v355_v8 = vmul.f32 %v354_v6, %v349_v3 }
 0x2e9   : > { %v356_v14 = vadd.f32 %v355_v8, %v345_v7 }
 0x2ea   : > { %v254_v9 = vpop.permute.xlu1 %253 }
 0x2eb   : > { %v256_v10 = vsel %vm250_vm2, %v254_v9, 0.0 }
 0x2ec   : > { %v365_v11 = vrot.slane %v256_v10, %v277_v39  ;;  %v376_v12 = vrot.slane %v256_v10, %v287_v41  ;;  %v387_v17 = vrot.slane %v256_v10, %v298_v40  ;;  %v398_v19 = vrot.slane %v256_v10, %v309_v48 }
 0x2ee   : > { %v366_v16 = vmul.f32 %v365_v11, %v360_v4  ;;  %v382_v18 = vpop.permute.xlu1 %381  ;;  %v377_v21 = vmul.f32 %v376_v12, %v371_v13  ;;  %v399_v25 = vmul.f32 %v398_v19, %v393_v23 }
 0x2ef   : > { %v388_v15 = vmul.f32 %v387_v17, %v382_v18 }
 0x2f0   : > { %v367_v20 = vadd.f32 %v366_v16, %v356_v14 }
 0x2f2   : > { %v378_v22 = vadd.f32 %v377_v21, %v367_v20  ;;  %v404_v27 = vpop.permute.xlu1 %403 }
 0x2f4   : > { %v389_v24 = vadd.f32 %v388_v15, %v378_v22 }
 0x2f6   : > { %v400_v26 = vadd.f32 %v399_v25, %v389_v24 }
 0x2f8   : > { %v406_v28 = vadd.f32 %v404_v27, %v400_v26 }
 0x2fa   : > { %v407_v29 = vmax.f32 %v406_v28, 0.0 }
 0x2fc   : > { %409 = vst.msk [vmem:[%s188_s13] sm:$0xff] %vm408_vm3, %v407_v29 }
 0x2fd   : > { %556 = shalt.err (!%p553_p3)
}
 0x2fe   : > { %s557_s30 = scalar_lea.hbm %s422_s23, 128  ;;  %s561_s8 = scalar_lea.hbm %s793_s4, 256 }
 0x2ff   : > { %p558_p4 = scmp.ne.s32.totalorder %s422_s23, %s557_s30  ;;  %p562_p9 = scmp.lt.s32.totalorder %s422_s23, %s793_s4 }
 0x300   : > { %p563_p10 = scmp.lt.s32.totalorder %s561_s8, %s557_s30 }
 0x301   : > { %p559_p7 = pnand %p558_p4, %p675_p5 }
 0x302   : > { %p564_p11 = por %p563_p10, %p562_p9 }
 0x303   : > { %p560_p8 = pneg %p559_p7 }
 0x305   : > { %p565_p12 = pnand %p564_p11, %p560_p8 }
 0x307   : > { %568 = shalt.err (!%p565_p12)
}
 0x308   : > { %496 = dma.vmem_to_hbm [thread:$0]  (%p675_p5), %s425_s14, 128, %s422_s23, %s411_s27  }
 0x309 PF: > { %p502_p13 = scmp.ge.s32.totalorder %s603_s18, 2  ;;  %s436_s11 = sand.u32 1, %s591_s15  }
 0x30a   : > { %s437_s12 = scalar_lea.sflag [#allocation3], %s436_s11 }
 0x30b   : > { %p499_p0 = pnand %p502_p13, %p679_p6 }
 0x30d   : > { %p500_p1 = pneg %p499_p0 }
 0x30f   : > { %586 = dma.done.wait (%p500_p1), %s437_s12, 128  }
 0x310   : > { %588 = vsyncadd (%p500_p1), %s437_s12, 4294967168  ;;  %p14_p2 = scmp.ge.s32.totalorder %s662_s21, 4   ;;  %s796_s15 = smov %s595_s16 }
 0x311   : > { %s797_s16 = smov %s599_s17  ;;  %s798_s17 = smov %s673_s24 }
 0x312   : > { %s799_s18 = smov %s662_s21  ;;  %16 = sbr.rel (!%p14_p2) target bundleno = 3 (0x3), region = 71 }
 0x317   :  { %442 = vsyncpa [#allocation3], 1 }
 0x318   :  { %444 = vsyncpa [#allocation3 + $0x1], 1 }

</bundles_post_ra>
